<compile_context>
chip_gen: v7x
topology: tpu7x:2x2x1
jax: 0.10.0
libtpu: 0.0.40
codegen_flags: <defaults>
</compile_context>

<pallas_src>
import functools
import math

import jax
import jax.numpy as jnp
from jax import lax
from jax.experimental import pallas as pl
from jax.experimental.pallas import tpu as pltpu


# ---------------------------------------------------------------------------
# Tiling helpers
# ---------------------------------------------------------------------------
def _choose_tile_m(m, target=512):
    """Row tile for the M-tiled dense kernels: divides m, multiple of 8 (or m)."""
    if m <= target:
        return m
    for tm in range(target, 7, -1):
        if m % tm == 0 and tm % 8 == 0:
            return tm
    return m


def _choose_time_chunk(t, max_chunk=32):
    """Timesteps per grid step in the recurrence: largest divisor of t <= max_chunk."""
    tc = min(t, max_chunk)
    while t % tc != 0:
        tc -= 1
    return tc


# ---------------------------------------------------------------------------
# Fused layer-0 projection: gx0 = relu(x @ W_in + b_in) @ W_ih0 + b_ih0
# ---------------------------------------------------------------------------
def input_proj_kernel(x_ref, w_in_ref, b_in_ref, w_ih_ref, b_ih_ref, o_ref):
    emb = jnp.dot(x_ref[...], w_in_ref[...], preferred_element_type=jnp.float32)
    emb = jnp.maximum(emb + b_in_ref[...], 0.0)
    gx = jnp.dot(emb, w_ih_ref[...], preferred_element_type=jnp.float32)
    o_ref[...] = (gx + b_ih_ref[...]).astype(o_ref.dtype)


def input_projection(x2d, w_in_t, b_in, w_ih_f, b_ih_f):
    M, I = x2d.shape
    E = w_in_t.shape[1]
    G = w_ih_f.shape[1]
    tm = _choose_tile_m(M)
    return pl.pallas_call(
        input_proj_kernel,
        out_shape=jax.ShapeDtypeStruct((M, G), x2d.dtype),
        grid_spec=pltpu.PrefetchScalarGridSpec(
            num_scalar_prefetch=0,
            grid=(M // tm,),
            in_specs=[
                pl.BlockSpec((tm, I), lambda m: (m, 0)),
                pl.BlockSpec((I, E), lambda m: (0, 0)),
                pl.BlockSpec((1, E), lambda m: (0, 0)),
                pl.BlockSpec((E, G), lambda m: (0, 0)),
                pl.BlockSpec((1, G), lambda m: (0, 0)),
            ],
            out_specs=pl.BlockSpec((tm, G), lambda m: (m, 0)),
        ),
        compiler_params=pltpu.CompilerParams(dimension_semantics=("parallel",)),
    )(x2d, w_in_t, b_in, w_ih_f, b_ih_f)


# ---------------------------------------------------------------------------
# Per-layer (l > 0) input-to-gates projection: gx = y_prev @ W_ih + b_ih
# ---------------------------------------------------------------------------
def gx_proj_kernel(x_ref, w_ref, b_ref, o_ref):
    o_ref[...] = (jnp.dot(x_ref[...], w_ref[...],
                          preferred_element_type=jnp.float32)
                  + b_ref[...]).astype(o_ref.dtype)


def gx_projection(x2d, w_f, b_f):
    M, K = x2d.shape
    G = w_f.shape[1]
    tm = _choose_tile_m(M)
    return pl.pallas_call(
        gx_proj_kernel,
        out_shape=jax.ShapeDtypeStruct((M, G), x2d.dtype),
        grid_spec=pltpu.PrefetchScalarGridSpec(
            num_scalar_prefetch=0,
            grid=(M // tm,),
            in_specs=[
                pl.BlockSpec((tm, K), lambda m: (m, 0)),
                pl.BlockSpec((K, G), lambda m: (0, 0)),
                pl.BlockSpec((1, G), lambda m: (0, 0)),
            ],
            out_specs=pl.BlockSpec((tm, G), lambda m: (m, 0)),
        ),
        compiler_params=pltpu.CompilerParams(dimension_semantics=("parallel",)),
    )(x2d, w_f, b_f)


# ---------------------------------------------------------------------------
# Fused output MLP: o = (relu(y @ W1 + b1)) @ W2 + b2
# ---------------------------------------------------------------------------
def output_mlp_kernel(x_ref, w1_ref, b1_ref, w2_ref, b2_ref, o_ref):
    h = jnp.dot(x_ref[...], w1_ref[...], preferred_element_type=jnp.float32)
    h = jnp.maximum(h + b1_ref[...], 0.0)
    o = jnp.dot(h, w2_ref[...], preferred_element_type=jnp.float32)
    o_ref[...] = (o + b2_ref[...]).astype(o_ref.dtype)


def output_mlp(x2d, w1_t, b1, w2_t, b2):
    M, H = x2d.shape
    E = w1_t.shape[1]
    O = w2_t.shape[1]
    tm = _choose_tile_m(M)
    return pl.pallas_call(
        output_mlp_kernel,
        out_shape=jax.ShapeDtypeStruct((M, O), x2d.dtype),
        grid_spec=pltpu.PrefetchScalarGridSpec(
            num_scalar_prefetch=0,
            grid=(M // tm,),
            in_specs=[
                pl.BlockSpec((tm, H), lambda m: (m, 0)),
                pl.BlockSpec((H, E), lambda m: (0, 0)),
                pl.BlockSpec((1, E), lambda m: (0, 0)),
                pl.BlockSpec((E, O), lambda m: (0, 0)),
                pl.BlockSpec((1, O), lambda m: (0, 0)),
            ],
            out_specs=pl.BlockSpec((tm, O), lambda m: (m, 0)),
        ),
        compiler_params=pltpu.CompilerParams(dimension_semantics=("parallel",)),
    )(x2d, w1_t, b1, w2_t, b2)


# ---------------------------------------------------------------------------
# GRU recurrence kernel: grid over time chunks; only h @ W_hh stays inside.
# gx is the precomputed x@W_ih + b_ih slab (time-major).
# ---------------------------------------------------------------------------
def gru_recurrence_kernel(gx_ref, whh_ref, bhh_ref, y_ref, hT_ref, h_scr,
                          *, tc, hidden_size):
    c = pl.program_id(0)
    H = hidden_size

    @pl.when(c == 0)
    def _():
        h_scr[...] = jnp.zeros_like(h_scr)   # hidden=None -> zeros

    whh = whh_ref[...]            # (H, 3H)  gates concatenated on lane axis
    bhh = bhh_ref[...]            # (1, 3H)

    def step(i, h):
        gx = gx_ref[i]            # (B, 3H) precomputed input gates
        gh = jnp.dot(h, whh, preferred_element_type=jnp.float32) + bhh
        r = jax.nn.sigmoid(gx[:, 0:H] + gh[:, 0:H])
        z = jax.nn.sigmoid(gx[:, H:2 * H] + gh[:, H:2 * H])
        n = jnp.tanh(gx[:, 2 * H:3 * H] + r * gh[:, 2 * H:3 * H])
        h_new = (1.0 - z) * n + z * h
        y_ref[i] = h_new.astype(y_ref.dtype)
        return h_new

    h_last = lax.fori_loop(0, tc, step, h_scr[...], unroll=True)
    h_scr[...] = h_last

    @pl.when(c == pl.num_programs(0) - 1)
    def _():
        hT_ref[...] = h_last.astype(hT_ref.dtype)


def gru_layer(gx_tm, whh_f, bhh_f, *, hidden_size, max_chunk=32):
    """gx_tm: (T, B, 3H) time-major precomputed input gates.
    Returns (y:(T,B,H) time-major, h_final:(B,H))."""
    T, B, G = gx_tm.shape
    H = hidden_size
    tc = _choose_time_chunk(T, max_chunk)
    nc = T // tc
    y, hT = pl.pallas_call(
        functools.partial(gru_recurrence_kernel, tc=tc, hidden_size=H),
        out_shape=(jax.ShapeDtypeStruct((T, B, H), gx_tm.dtype),
                   jax.ShapeDtypeStruct((B, H), gx_tm.dtype)),
        grid_spec=pltpu.PrefetchScalarGridSpec(
            num_scalar_prefetch=0,
            grid=(nc,),
            in_specs=[
                pl.BlockSpec((tc, B, G), lambda c: (c, 0, 0)),   # gx chunk
                pl.BlockSpec((H, G), lambda c: (0, 0)),          # W_hh fused (r|z|n)
                pl.BlockSpec((1, G), lambda c: (0, 0)),          # b_hh fused
            ],
            out_specs=[
                pl.BlockSpec((tc, B, H), lambda c: (c, 0, 0)),   # outputs chunk
                pl.BlockSpec((B, H), lambda c: (0, 0)),          # final hidden
            ],
            scratch_shapes=[pltpu.VMEM((B, H), jnp.float32)],
        ),
        compiler_params=pltpu.CompilerParams(
            dimension_semantics=("arbitrary",)),                 # true recurrence
    )(gx_tm, whh_f, bhh_f)
    return y, hT


# ---------------------------------------------------------------------------
# Parameter init (deterministic, mirrors the module's init scheme)
# ---------------------------------------------------------------------------
def _xavier_uniform(key, shape, gain):
    fan_out, fan_in = shape  # torch weight convention: (out_features, in_features)
    bound = gain * math.sqrt(6.0 / (fan_in + fan_out))
    return jax.random.uniform(key, shape, jnp.float32, -bound, bound)


def init_params(key, input_size, embedding_size, hidden_size, num_layers,
                output_size):
    relu_gain = math.sqrt(2.0)   # nn.init.calculate_gain('relu')
    sig_gain = 1.0               # nn.init.calculate_gain('sigmoid')
    keys = jax.random.split(key, 3 + 2 * num_layers)
    params = {}

    # self.input = nn.Linear(input_size, embedding_size)  (xavier, relu gain)
    params['in_w_t'] = _xavier_uniform(keys[0], (embedding_size, input_size),
                                       relu_gain).T
    params['in_b'] = jnp.zeros((1, embedding_size), jnp.float32)

    # self.output = Linear(hidden, emb) -> ReLU -> Linear(emb, output_size)
    params['out1_w_t'] = _xavier_uniform(keys[1], (embedding_size, hidden_size),
                                         relu_gain).T
    params['out1_b'] = jnp.zeros((1, embedding_size), jnp.float32)
    params['out2_w_t'] = _xavier_uniform(keys[2], (output_size, embedding_size),
                                         relu_gain).T
    params['out2_b'] = jnp.zeros((1, output_size), jnp.float32)

    # GRU weights: xavier(sigmoid gain), biases constant 0.25.
    # Stored gate-fused: W^T with columns [r | z | n] so one matmul feeds all gates.
    params['gru'] = []
    for layer in range(num_layers):
        in_sz = embedding_size if layer == 0 else hidden_size
        k1, k2 = jax.random.split(keys[3 + layer], 2)
        w_ih = _xavier_uniform(k1, (3 * hidden_size, in_sz), sig_gain)
        w_hh = _xavier_uniform(k2, (3 * hidden_size, hidden_size), sig_gain)
        params['gru'].append(dict(
            w_ih_f=w_ih.T,                                       # (in, 3H)
            w_hh_f=w_hh.T,                                       # (H, 3H)
            b_ih_f=jnp.full((1, 3 * hidden_size), 0.25, jnp.float32),
            b_hh_f=jnp.full((1, 3 * hidden_size), 0.25, jnp.float32),
        ))
    return params


# ---------------------------------------------------------------------------
# Forward pass (has_input=True, has_output=True, pack=False, hidden=None->0)
# ---------------------------------------------------------------------------
def gru_plain_forward(x, params, *, hidden_size, num_layers):
    B, T, I = x.shape
    H = hidden_size

    # Go time-major once on the tiny raw input; everything downstream stays
    # time-major so no per-layer layout passes are needed.
    x_tm = jnp.transpose(x, (1, 0, 2)).reshape(T * B, I)

    # Layer 0: fused relu(Linear(x)) @ W_ih0 + b_ih0  -> (T*B, 3H)
    gru0 = params['gru'][0]
    gx = input_projection(x_tm, params['in_w_t'], params['in_b'],
                          gru0['w_ih_f'], gru0['b_ih_f'])

    h_finals = []
    y2d = None
    for layer in range(num_layers):
        lp = params['gru'][layer]
        if layer > 0:
            # Hoisted input projection for this layer (one big matmul).
            gx = gx_projection(y2d, lp['w_ih_f'], lp['b_ih_f'])
        y, hT = gru_layer(gx.reshape(T, B, 3 * H), lp['w_hh_f'], lp['b_hh_f'],
                          hidden_size=H)
        y2d = y.reshape(T * B, H)
        h_finals.append(hT)

    # output MLP (fused Linear -> ReLU -> Linear) over all timesteps at once.
    o = output_mlp(y2d, params['out1_w_t'], params['out1_b'],
                   params['out2_w_t'], params['out2_b'])          # (T*B, O)
    O = o.shape[-1]
    output_raw = jnp.transpose(o.reshape(T, B, O), (1, 0, 2))     # (B, T, O)

    hidden = jnp.stack(h_finals, axis=0)                          # (layers, B, H)
    return output_raw, hidden


if __name__ == "__main__":
    input_size, embedding_size, hidden_size = 16, 32, 32
    num_layers, output_size = 2, 16
    B, T = 2, 8

    key = jax.random.PRNGKey(0)
    kp, kx = jax.random.split(key)
    params = init_params(kp, input_size, embedding_size, hidden_size,
                         num_layers, output_size)
    x = jax.random.normal(kx, (B, T, input_size), jnp.float32)

    fwd = jax.jit(functools.partial(gru_plain_forward,
                                    hidden_size=hidden_size,
                                    num_layers=num_layers))
    output_raw, hidden = fwd(x, params)
    jax.block_until_ready(output_raw)
    jax.block_until_ready(hidden)

    assert output_raw.shape == (B, T, output_size)
    assert hidden.shape == (num_layers, B, hidden_size)
    print("KERNEL_OK")
</pallas_src>

<mosaic_0001>
module attributes {stable_mosaic.version = 11 : i64} {
  func.func @input_proj_kernel(%arg0: i32, %arg1: memref<16x16xf32, #tpu.memory_space<vmem>>, %arg2: memref<16x32xf32, #tpu.memory_space<vmem>>, %arg3: memref<1x32xf32, #tpu.memory_space<vmem>>, %arg4: memref<32x96xf32, #tpu.memory_space<vmem>>, %arg5: memref<1x96xf32, #tpu.memory_space<vmem>>, %arg6: memref<16x96xf32, #tpu.memory_space<vmem>>) attributes {dimension_semantics = [#tpu.dimension_semantics<parallel>], iteration_bounds = array<i64: 1>, scalar_prefetch = 0 : i64, scratch_operands = 0 : i64, tpu.core_type = #tpu.core_type<tc>, window_params = [{transform_indices = @transform_0, window_bounds = array<i64: 16, 16>}, {pipeline_mode = #tpu.pipeline_mode<synchronous>, transform_indices = @transform_1, window_bounds = array<i64: 16, 32>}, {pipeline_mode = #tpu.pipeline_mode<synchronous>, transform_indices = @transform_2, window_bounds = array<i64: 1, 32>}, {pipeline_mode = #tpu.pipeline_mode<synchronous>, transform_indices = @transform_3, window_bounds = array<i64: 32, 96>}, {pipeline_mode = #tpu.pipeline_mode<synchronous>, transform_indices = @transform_4, window_bounds = array<i64: 1, 96>}, {transform_indices = @transform_5, window_bounds = array<i64: 16, 96>}]} {
    %c0 = arith.constant 0 : index
    %c0_0 = arith.constant 0 : index
    %0 = vector.load %arg1[%c0, %c0_0] : memref<16x16xf32, #tpu.memory_space<vmem>>, vector<16x16xf32>
    %c0_1 = arith.constant 0 : index
    %c0_2 = arith.constant 0 : index
    %1 = vector.load %arg2[%c0_1, %c0_2] : memref<16x32xf32, #tpu.memory_space<vmem>>, vector<16x32xf32>
    %cst = arith.constant dense<0.000000e+00> : vector<16x32xf32>
    %2 = tpu.matmul %0, %1, %cst {dimension_numbers = #tpu.dot_dimension_numbers<[1], [0], [0], [1], [0, 0, 1, 1], [], []>} : vector<16x16xf32>, vector<16x32xf32>, vector<16x32xf32> -> vector<16x32xf32>
    %c0_3 = arith.constant 0 : index
    %c0_4 = arith.constant 0 : index
    %3 = vector.load %arg3[%c0_3, %c0_4] : memref<1x32xf32, #tpu.memory_space<vmem>>, vector<1x32xf32>
    %4 = vector.broadcast %3 : vector<1x32xf32> to vector<16x32xf32>
    %5 = arith.addf %2, %4 : vector<16x32xf32>
    %cst_5 = arith.constant 0.000000e+00 : f32
    %6 = vector.broadcast %cst_5 : f32 to vector<16x32xf32>
    %7 = arith.maximumf %5, %6 : vector<16x32xf32>
    %c0_6 = arith.constant 0 : index
    %c0_7 = arith.constant 0 : index
    %8 = vector.load %arg4[%c0_6, %c0_7] : memref<32x96xf32, #tpu.memory_space<vmem>>, vector<32x96xf32>
    %cst_8 = arith.constant dense<0.000000e+00> : vector<16x96xf32>
    %9 = tpu.matmul %7, %8, %cst_8 {dimension_numbers = #tpu.dot_dimension_numbers<[1], [0], [0], [1], [0, 0, 1, 1], [], []>} : vector<16x32xf32>, vector<32x96xf32>, vector<16x96xf32> -> vector<16x96xf32>
    %c0_9 = arith.constant 0 : index
    %c0_10 = arith.constant 0 : index
    %10 = vector.load %arg5[%c0_9, %c0_10] : memref<1x96xf32, #tpu.memory_space<vmem>>, vector<1x96xf32>
    %11 = vector.broadcast %10 : vector<1x96xf32> to vector<16x96xf32>
    %12 = arith.addf %9, %11 : vector<16x96xf32>
    %c0_11 = arith.constant 0 : index
    %c0_12 = arith.constant 0 : index
    %13 = vector.load %arg6[%c0_11, %c0_12] : memref<16x96xf32, #tpu.memory_space<vmem>>, vector<16x96xf32>
    tpu.vector_store %arg6[%c0_11, %c0_12], %12 {strides = array<i32>} : memref<16x96xf32, #tpu.memory_space<vmem>>, vector<16x96xf32>,
    return
  }
  func.func @transform_0(%arg0: i32) -> (i32, i32) {
    %c0_i32 = arith.constant 0 : i32
    %c0_i32_0 = arith.constant 0 : i32
    return %arg0, %c0_i32 : i32, i32
  }
  func.func @transform_1(%arg0: i32) -> (i32, i32) {
    %c0_i32 = arith.constant 0 : i32
    %c0_i32_0 = arith.constant 0 : i32
    %c0_i32_1 = arith.constant 0 : i32
    return %c0_i32, %c0_i32_0 : i32, i32
  }
  func.func @transform_2(%arg0: i32) -> (i32, i32) {
    %c0_i32 = arith.constant 0 : i32
    %c0_i32_0 = arith.constant 0 : i32
    %c0_i32_1 = arith.constant 0 : i32
    return %c0_i32, %c0_i32_0 : i32, i32
  }
  func.func @transform_3(%arg0: i32) -> (i32, i32) {
    %c0_i32 = arith.constant 0 : i32
    %c0_i32_0 = arith.constant 0 : i32
    %c0_i32_1 = arith.constant 0 : i32
    return %c0_i32, %c0_i32_0 : i32, i32
  }
  func.func @transform_4(%arg0: i32) -> (i32, i32) {
    %c0_i32 = arith.constant 0 : i32
    %c0_i32_0 = arith.constant 0 : i32
    %c0_i32_1 = arith.constant 0 : i32
    return %c0_i32, %c0_i32_0 : i32, i32
  }
  func.func @transform_5(%arg0: i32) -> (i32, i32) {
    %c0_i32 = arith.constant 0 : i32
    %c0_i32_0 = arith.constant 0 : i32
    return %arg0, %c0_i32 : i32, i32
  }
}

module attributes {stable_mosaic.version = 11 : i64} {
  func.func @gx_proj_kernel(%arg0: i32, %arg1: memref<16x32xf32, #tpu.memory_space<vmem>>, %arg2: memref<32x96xf32, #tpu.memory_space<vmem>>, %arg3: memref<1x96xf32, #tpu.memory_space<vmem>>, %arg4: memref<16x96xf32, #tpu.memory_space<vmem>>) attributes {dimension_semantics = [#tpu.dimension_semantics<parallel>], iteration_bounds = array<i64: 1>, scalar_prefetch = 0 : i64, scratch_operands = 0 : i64, tpu.core_type = #tpu.core_type<tc>, window_params = [{transform_indices = @transform_0, window_bounds = array<i64: 16, 32>}, {pipeline_mode = #tpu.pipeline_mode<synchronous>, transform_indices = @transform_1, window_bounds = array<i64: 32, 96>}, {pipeline_mode = #tpu.pipeline_mode<synchronous>, transform_indices = @transform_2, window_bounds = array<i64: 1, 96>}, {transform_indices = @transform_3, window_bounds = array<i64: 16, 96>}]} {
    %c0 = arith.constant 0 : index
    %c0_0 = arith.constant 0 : index
    %0 = vector.load %arg1[%c0, %c0_0] : memref<16x32xf32, #tpu.memory_space<vmem>>, vector<16x32xf32>
    %c0_1 = arith.constant 0 : index
    %c0_2 = arith.constant 0 : index
    %1 = vector.load %arg2[%c0_1, %c0_2] : memref<32x96xf32, #tpu.memory_space<vmem>>, vector<32x96xf32>
    %cst = arith.constant dense<0.000000e+00> : vector<16x96xf32>
    %2 = tpu.matmul %0, %1, %cst {dimension_numbers = #tpu.dot_dimension_numbers<[1], [0], [0], [1], [0, 0, 1, 1], [], []>} : vector<16x32xf32>, vector<32x96xf32>, vector<16x96xf32> -> vector<16x96xf32>
    %c0_3 = arith.constant 0 : index
    %c0_4 = arith.constant 0 : index
    %3 = vector.load %arg3[%c0_3, %c0_4] : memref<1x96xf32, #tpu.memory_space<vmem>>, vector<1x96xf32>
    %4 = vector.broadcast %3 : vector<1x96xf32> to vector<16x96xf32>
    %5 = arith.addf %2, %4 : vector<16x96xf32>
    %c0_5 = arith.constant 0 : index
    %c0_6 = arith.constant 0 : index
    %6 = vector.load %arg4[%c0_5, %c0_6] : memref<16x96xf32, #tpu.memory_space<vmem>>, vector<16x96xf32>
    tpu.vector_store %arg4[%c0_5, %c0_6], %5 {strides = array<i32>} : memref<16x96xf32, #tpu.memory_space<vmem>>, vector<16x96xf32>,
    return
  }
  func.func @transform_0(%arg0: i32) -> (i32, i32) {
    %c0_i32 = arith.constant 0 : i32
    %c0_i32_0 = arith.constant 0 : i32
    return %arg0, %c0_i32 : i32, i32
  }
  func.func @transform_1(%arg0: i32) -> (i32, i32) {
    %c0_i32 = arith.constant 0 : i32
    %c0_i32_0 = arith.constant 0 : i32
    %c0_i32_1 = arith.constant 0 : i32
    return %c0_i32, %c0_i32_0 : i32, i32
  }
  func.func @transform_2(%arg0: i32) -> (i32, i32) {
    %c0_i32 = arith.constant 0 : i32
    %c0_i32_0 = arith.constant 0 : i32
    %c0_i32_1 = arith.constant 0 : i32
    return %c0_i32, %c0_i32_0 : i32, i32
  }
  func.func @transform_3(%arg0: i32) -> (i32, i32) {
    %c0_i32 = arith.constant 0 : i32
    %c0_i32_0 = arith.constant 0 : i32
    return %arg0, %c0_i32 : i32, i32
  }
}

module attributes {stable_mosaic.version = 11 : i64} {
  func.func @gru_recurrence_kernel(%arg0: i32, %arg1: memref<8x2x96xf32, #tpu.memory_space<vmem>>, %arg2: memref<32x96xf32, #tpu.memory_space<vmem>>, %arg3: memref<1x96xf32, #tpu.memory_space<vmem>>, %arg4: memref<8x2x32xf32, #tpu.memory_space<vmem>>, %arg5: memref<2x32xf32, #tpu.memory_space<vmem>>, %arg6: memref<2x32xf32, #tpu.memory_space<vmem>>) attributes {dimension_semantics = [#tpu.dimension_semantics<arbitrary>], iteration_bounds = array<i64: 1>, scalar_prefetch = 0 : i64, scratch_operands = 1 : i64, tpu.core_type = #tpu.core_type<tc>, window_params = [{transform_indices = @transform_0, window_bounds = array<i64: 8, 2, 96>}, {pipeline_mode = #tpu.pipeline_mode<synchronous>, transform_indices = @transform_1, window_bounds = array<i64: 32, 96>}, {pipeline_mode = #tpu.pipeline_mode<synchronous>, transform_indices = @transform_2, window_bounds = array<i64: 1, 96>}, {transform_indices = @transform_3, window_bounds = array<i64: 8, 2, 32>}, {pipeline_mode = #tpu.pipeline_mode<synchronous>, transform_indices = @transform_4, window_bounds = array<i64: 2, 32>}]} {
    %c0_i32 = arith.constant 0 : i32
    %0 = arith.cmpi eq, %arg0, %c0_i32 : i32
    %1 = arith.extui %0 : i1 to i32
    %c0_i32_0 = arith.constant 0 : i32
    %2 = arith.cmpi ne, %1, %c0_i32_0 : i32
    scf.if %2 {
      %cst_74 = arith.constant 0.000000e+00 : f32
      %298 = vector.broadcast %cst_74 : f32 to vector<2x32xf32>
      %c0_75 = arith.constant 0 : index
      %c0_76 = arith.constant 0 : index
      %299 = vector.load %arg6[%c0_75, %c0_76] : memref<2x32xf32, #tpu.memory_space<vmem>>, vector<2x32xf32>
      tpu.vector_store %arg6[%c0_75, %c0_76], %298 {strides = array<i32>} : memref<2x32xf32, #tpu.memory_space<vmem>>, vector<2x32xf32>,
    } else {
    }
    %c0 = arith.constant 0 : index
    %c0_1 = arith.constant 0 : index
    %3 = vector.load %arg2[%c0, %c0_1] : memref<32x96xf32, #tpu.memory_space<vmem>>, vector<32x96xf32>
    %c0_2 = arith.constant 0 : index
    %c0_3 = arith.constant 0 : index
    %4 = vector.load %arg3[%c0_2, %c0_3] : memref<1x96xf32, #tpu.memory_space<vmem>>, vector<1x96xf32>
    %c0_4 = arith.constant 0 : index
    %c0_5 = arith.constant 0 : index
    %5 = vector.load %arg6[%c0_4, %c0_5] : memref<2x32xf32, #tpu.memory_space<vmem>>, vector<2x32xf32>
    %c0_i32_6 = arith.constant 0 : i32
    %6 = arith.index_cast %c0_i32_6 : i32 to index
    %c0_7 = arith.constant 0 : index
    %c0_8 = arith.constant 0 : index
    %7 = vector.load %arg1[%6, %c0_7, %c0_8] : memref<8x2x96xf32, #tpu.memory_space<vmem>>, vector<1x2x96xf32>
    %8 = vector.shape_cast %7 : vector<1x2x96xf32> to vector<2x96xf32>
    %cst = arith.constant dense<0.000000e+00> : vector<2x96xf32>
    %9 = tpu.matmul %5, %3, %cst {dimension_numbers = #tpu.dot_dimension_numbers<[1], [0], [0], [1], [0, 0, 1, 1], [], []>} : vector<2x32xf32>, vector<32x96xf32>, vector<2x96xf32> -> vector<2x96xf32>
    %10 = vector.broadcast %4 : vector<1x96xf32> to vector<2x96xf32>
    %11 = arith.addf %9, %10 : vector<2x96xf32>
    %12 = vector.extract_strided_slice %8 {offsets = [0, 0], sizes = [2, 32], strides = [1, 1]} : vector<2x96xf32> to vector<2x32xf32>
    %13 = vector.extract_strided_slice %11 {offsets = [0, 0], sizes = [2, 32], strides = [1, 1]} : vector<2x96xf32> to vector<2x32xf32>
    %14 = arith.addf %12, %13 : vector<2x32xf32>
    %15 = arith.negf %14 : vector<2x32xf32>
    %16 = math.exp %15 : vector<2x32xf32>
    %cst_9 = arith.constant 1.000000e+00 : f32
    %17 = vector.broadcast %cst_9 : f32 to vector<2x32xf32>
    %18 = arith.addf %17, %16 : vector<2x32xf32>
    %19 = arith.divf %17, %18 : vector<2x32xf32>
    %20 = vector.extract_strided_slice %8 {offsets = [0, 32], sizes = [2, 32], strides = [1, 1]} : vector<2x96xf32> to vector<2x32xf32>
    %21 = vector.extract_strided_slice %11 {offsets = [0, 32], sizes = [2, 32], strides = [1, 1]} : vector<2x96xf32> to vector<2x32xf32>
    %22 = arith.addf %20, %21 : vector<2x32xf32>
    %23 = arith.negf %22 : vector<2x32xf32>
    %24 = math.exp %23 : vector<2x32xf32>
    %cst_10 = arith.constant 1.000000e+00 : f32
    %25 = vector.broadcast %cst_10 : f32 to vector<2x32xf32>
    %26 = arith.addf %25, %24 : vector<2x32xf32>
    %27 = arith.divf %25, %26 : vector<2x32xf32>
    %28 = vector.extract_strided_slice %8 {offsets = [0, 64], sizes = [2, 32], strides = [1, 1]} : vector<2x96xf32> to vector<2x32xf32>
    %29 = vector.extract_strided_slice %11 {offsets = [0, 64], sizes = [2, 32], strides = [1, 1]} : vector<2x96xf32> to vector<2x32xf32>
    %30 = arith.mulf %19, %29 : vector<2x32xf32>
    %31 = arith.addf %28, %30 : vector<2x32xf32>
    %32 = math.tanh %31 : vector<2x32xf32>
    %cst_11 = arith.constant 1.000000e+00 : f32
    %33 = vector.broadcast %cst_11 : f32 to vector<2x32xf32>
    %34 = arith.subf %33, %27 : vector<2x32xf32>
    %35 = arith.mulf %34, %32 : vector<2x32xf32>
    %36 = arith.mulf %27, %5 : vector<2x32xf32>
    %37 = arith.addf %35, %36 : vector<2x32xf32>
    %38 = arith.index_cast %c0_i32_6 : i32 to index
    %c0_12 = arith.constant 0 : index
    %c0_13 = arith.constant 0 : index
    %39 = vector.load %arg4[%38, %c0_12, %c0_13] : memref<8x2x32xf32, #tpu.memory_space<vmem>>, vector<1x2x32xf32>
    %40 = vector.shape_cast %39 : vector<1x2x32xf32> to vector<2x32xf32>
    %41 = vector.shape_cast %37 : vector<2x32xf32> to vector<1x2x32xf32>
    tpu.vector_store %arg4[%38, %c0_12, %c0_13], %41 {strides = array<i32>} : memref<8x2x32xf32, #tpu.memory_space<vmem>>, vector<1x2x32xf32>,
    %c1_i32 = arith.constant 1 : i32
    %42 = arith.index_cast %c1_i32 : i32 to index
    %c0_14 = arith.constant 0 : index
    %c0_15 = arith.constant 0 : index
    %43 = vector.load %arg1[%42, %c0_14, %c0_15] : memref<8x2x96xf32, #tpu.memory_space<vmem>>, vector<1x2x96xf32>
    %44 = vector.shape_cast %43 : vector<1x2x96xf32> to vector<2x96xf32>
    %cst_16 = arith.constant dense<0.000000e+00> : vector<2x96xf32>
    %45 = tpu.matmul %37, %3, %cst_16 {dimension_numbers = #tpu.dot_dimension_numbers<[1], [0], [0], [1], [0, 0, 1, 1], [], []>} : vector<2x32xf32>, vector<32x96xf32>, vector<2x96xf32> -> vector<2x96xf32>
    %46 = vector.broadcast %4 : vector<1x96xf32> to vector<2x96xf32>
    %47 = arith.addf %45, %46 : vector<2x96xf32>
    %48 = vector.extract_strided_slice %44 {offsets = [0, 0], sizes = [2, 32], strides = [1, 1]} : vector<2x96xf32> to vector<2x32xf32>
    %49 = vector.extract_strided_slice %47 {offsets = [0, 0], sizes = [2, 32], strides = [1, 1]} : vector<2x96xf32> to vector<2x32xf32>
    %50 = arith.addf %48, %49 : vector<2x32xf32>
    %51 = arith.negf %50 : vector<2x32xf32>
    %52 = math.exp %51 : vector<2x32xf32>
    %cst_17 = arith.constant 1.000000e+00 : f32
    %53 = vector.broadcast %cst_17 : f32 to vector<2x32xf32>
    %54 = arith.addf %53, %52 : vector<2x32xf32>
    %55 = arith.divf %53, %54 : vector<2x32xf32>
    %56 = vector.extract_strided_slice %44 {offsets = [0, 32], sizes = [2, 32], strides = [1, 1]} : vector<2x96xf32> to vector<2x32xf32>
    %57 = vector.extract_strided_slice %47 {offsets = [0, 32], sizes = [2, 32], strides = [1, 1]} : vector<2x96xf32> to vector<2x32xf32>
    %58 = arith.addf %56, %57 : vector<2x32xf32>
    %59 = arith.negf %58 : vector<2x32xf32>
    %60 = math.exp %59 : vector<2x32xf32>
    %cst_18 = arith.constant 1.000000e+00 : f32
    %61 = vector.broadcast %cst_18 : f32 to vector<2x32xf32>
    %62 = arith.addf %61, %60 : vector<2x32xf32>
    %63 = arith.divf %61, %62 : vector<2x32xf32>
    %64 = vector.extract_strided_slice %44 {offsets = [0, 64], sizes = [2, 32], strides = [1, 1]} : vector<2x96xf32> to vector<2x32xf32>
    %65 = vector.extract_strided_slice %47 {offsets = [0, 64], sizes = [2, 32], strides = [1, 1]} : vector<2x96xf32> to vector<2x32xf32>
    %66 = arith.mulf %55, %65 : vector<2x32xf32>
    %67 = arith.addf %64, %66 : vector<2x32xf32>
    %68 = math.tanh %67 : vector<2x32xf32>
    %cst_19 = arith.constant 1.000000e+00 : f32
    %69 = vector.broadcast %cst_19 : f32 to vector<2x32xf32>
    %70 = arith.subf %69, %63 : vector<2x32xf32>
    %71 = arith.mulf %70, %68 : vector<2x32xf32>
    %72 = arith.mulf %63, %37 : vector<2x32xf32>
    %73 = arith.addf %71, %72 : vector<2x32xf32>
    %74 = arith.index_cast %c1_i32 : i32 to index
    %c0_20 = arith.constant 0 : index
    %c0_21 = arith.constant 0 : index
    %75 = vector.load %arg4[%74, %c0_20, %c0_21] : memref<8x2x32xf32, #tpu.memory_space<vmem>>, vector<1x2x32xf32>
    %76 = vector.shape_cast %75 : vector<1x2x32xf32> to vector<2x32xf32>
    %77 = vector.shape_cast %73 : vector<2x32xf32> to vector<1x2x32xf32>
    tpu.vector_store %arg4[%74, %c0_20, %c0_21], %77 {strides = array<i32>} : memref<8x2x32xf32, #tpu.memory_space<vmem>>, vector<1x2x32xf32>,
    %c2_i32 = arith.constant 2 : i32
    %78 = arith.index_cast %c2_i32 : i32 to index
    %c0_22 = arith.constant 0 : index
    %c0_23 = arith.constant 0 : index
    %79 = vector.load %arg1[%78, %c0_22, %c0_23] : memref<8x2x96xf32, #tpu.memory_space<vmem>>, vector<1x2x96xf32>
    %80 = vector.shape_cast %79 : vector<1x2x96xf32> to vector<2x96xf32>
    %cst_24 = arith.constant dense<0.000000e+00> : vector<2x96xf32>
    %81 = tpu.matmul %73, %3, %cst_24 {dimension_numbers = #tpu.dot_dimension_numbers<[1], [0], [0], [1], [0, 0, 1, 1], [], []>} : vector<2x32xf32>, vector<32x96xf32>, vector<2x96xf32> -> vector<2x96xf32>
    %82 = vector.broadcast %4 : vector<1x96xf32> to vector<2x96xf32>
    %83 = arith.addf %81, %82 : vector<2x96xf32>
    %84 = vector.extract_strided_slice %80 {offsets = [0, 0], sizes = [2, 32], strides = [1, 1]} : vector<2x96xf32> to vector<2x32xf32>
    %85 = vector.extract_strided_slice %83 {offsets = [0, 0], sizes = [2, 32], strides = [1, 1]} : vector<2x96xf32> to vector<2x32xf32>
    %86 = arith.addf %84, %85 : vector<2x32xf32>
    %87 = arith.negf %86 : vector<2x32xf32>
    %88 = math.exp %87 : vector<2x32xf32>
    %cst_25 = arith.constant 1.000000e+00 : f32
    %89 = vector.broadcast %cst_25 : f32 to vector<2x32xf32>
    %90 = arith.addf %89, %88 : vector<2x32xf32>
    %91 = arith.divf %89, %90 : vector<2x32xf32>
    %92 = vector.extract_strided_slice %80 {offsets = [0, 32], sizes = [2, 32], strides = [1, 1]} : vector<2x96xf32> to vector<2x32xf32>
    %93 = vector.extract_strided_slice %83 {offsets = [0, 32], sizes = [2, 32], strides = [1, 1]} : vector<2x96xf32> to vector<2x32xf32>
    %94 = arith.addf %92, %93 : vector<2x32xf32>
    %95 = arith.negf %94 : vector<2x32xf32>
    %96 = math.exp %95 : vector<2x32xf32>
    %cst_26 = arith.constant 1.000000e+00 : f32
    %97 = vector.broadcast %cst_26 : f32 to vector<2x32xf32>
    %98 = arith.addf %97, %96 : vector<2x32xf32>
    %99 = arith.divf %97, %98 : vector<2x32xf32>
    %100 = vector.extract_strided_slice %80 {offsets = [0, 64], sizes = [2, 32], strides = [1, 1]} : vector<2x96xf32> to vector<2x32xf32>
    %101 = vector.extract_strided_slice %83 {offsets = [0, 64], sizes = [2, 32], strides = [1, 1]} : vector<2x96xf32> to vector<2x32xf32>
    %102 = arith.mulf %91, %101 : vector<2x32xf32>
    %103 = arith.addf %100, %102 : vector<2x32xf32>
    %104 = math.tanh %103 : vector<2x32xf32>
    %cst_27 = arith.constant 1.000000e+00 : f32
    %105 = vector.broadcast %cst_27 : f32 to vector<2x32xf32>
    %106 = arith.subf %105, %99 : vector<2x32xf32>
    %107 = arith.mulf %106, %104 : vector<2x32xf32>
    %108 = arith.mulf %99, %73 : vector<2x32xf32>
    %109 = arith.addf %107, %108 : vector<2x32xf32>
    %110 = arith.index_cast %c2_i32 : i32 to index
    %c0_28 = arith.constant 0 : index
    %c0_29 = arith.constant 0 : index
    %111 = vector.load %arg4[%110, %c0_28, %c0_29] : memref<8x2x32xf32, #tpu.memory_space<vmem>>, vector<1x2x32xf32>
    %112 = vector.shape_cast %111 : vector<1x2x32xf32> to vector<2x32xf32>
    %113 = vector.shape_cast %109 : vector<2x32xf32> to vector<1x2x32xf32>
    tpu.vector_store %arg4[%110, %c0_28, %c0_29], %113 {strides = array<i32>} : memref<8x2x32xf32, #tpu.memory_space<vmem>>, vector<1x2x32xf32>,
    %c3_i32 = arith.constant 3 : i32
    %114 = arith.index_cast %c3_i32 : i32 to index
    %c0_30 = arith.constant 0 : index
    %c0_31 = arith.constant 0 : index
    %115 = vector.load %arg1[%114, %c0_30, %c0_31] : memref<8x2x96xf32, #tpu.memory_space<vmem>>, vector<1x2x96xf32>
    %116 = vector.shape_cast %115 : vector<1x2x96xf32> to vector<2x96xf32>
    %cst_32 = arith.constant dense<0.000000e+00> : vector<2x96xf32>
    %117 = tpu.matmul %109, %3, %cst_32 {dimension_numbers = #tpu.dot_dimension_numbers<[1], [0], [0], [1], [0, 0, 1, 1], [], []>} : vector<2x32xf32>, vector<32x96xf32>, vector<2x96xf32> -> vector<2x96xf32>
    %118 = vector.broadcast %4 : vector<1x96xf32> to vector<2x96xf32>
    %119 = arith.addf %117, %118 : vector<2x96xf32>
    %120 = vector.extract_strided_slice %116 {offsets = [0, 0], sizes = [2, 32], strides = [1, 1]} : vector<2x96xf32> to vector<2x32xf32>
    %121 = vector.extract_strided_slice %119 {offsets = [0, 0], sizes = [2, 32], strides = [1, 1]} : vector<2x96xf32> to vector<2x32xf32>
    %122 = arith.addf %120, %121 : vector<2x32xf32>
    %123 = arith.negf %122 : vector<2x32xf32>
    %124 = math.exp %123 : vector<2x32xf32>
    %cst_33 = arith.constant 1.000000e+00 : f32
    %125 = vector.broadcast %cst_33 : f32 to vector<2x32xf32>
    %126 = arith.addf %125, %124 : vector<2x32xf32>
    %127 = arith.divf %125, %126 : vector<2x32xf32>
    %128 = vector.extract_strided_slice %116 {offsets = [0, 32], sizes = [2, 32], strides = [1, 1]} : vector<2x96xf32> to vector<2x32xf32>
    %129 = vector.extract_strided_slice %119 {offsets = [0, 32], sizes = [2, 32], strides = [1, 1]} : vector<2x96xf32> to vector<2x32xf32>
    %130 = arith.addf %128, %129 : vector<2x32xf32>
    %131 = arith.negf %130 : vector<2x32xf32>
    %132 = math.exp %131 : vector<2x32xf32>
    %cst_34 = arith.constant 1.000000e+00 : f32
    %133 = vector.broadcast %cst_34 : f32 to vector<2x32xf32>
    %134 = arith.addf %133, %132 : vector<2x32xf32>
    %135 = arith.divf %133, %134 : vector<2x32xf32>
    %136 = vector.extract_strided_slice %116 {offsets = [0, 64], sizes = [2, 32], strides = [1, 1]} : vector<2x96xf32> to vector<2x32xf32>
    %137 = vector.extract_strided_slice %119 {offsets = [0, 64], sizes = [2, 32], strides = [1, 1]} : vector<2x96xf32> to vector<2x32xf32>
    %138 = arith.mulf %127, %137 : vector<2x32xf32>
    %139 = arith.addf %136, %138 : vector<2x32xf32>
    %140 = math.tanh %139 : vector<2x32xf32>
    %cst_35 = arith.constant 1.000000e+00 : f32
    %141 = vector.broadcast %cst_35 : f32 to vector<2x32xf32>
    %142 = arith.subf %141, %135 : vector<2x32xf32>
    %143 = arith.mulf %142, %140 : vector<2x32xf32>
    %144 = arith.mulf %135, %109 : vector<2x32xf32>
    %145 = arith.addf %143, %144 : vector<2x32xf32>
    %146 = arith.index_cast %c3_i32 : i32 to index
    %c0_36 = arith.constant 0 : index
    %c0_37 = arith.constant 0 : index
    %147 = vector.load %arg4[%146, %c0_36, %c0_37] : memref<8x2x32xf32, #tpu.memory_space<vmem>>, vector<1x2x32xf32>
    %148 = vector.shape_cast %147 : vector<1x2x32xf32> to vector<2x32xf32>
    %149 = vector.shape_cast %145 : vector<2x32xf32> to vector<1x2x32xf32>
    tpu.vector_store %arg4[%146, %c0_36, %c0_37], %149 {strides = array<i32>} : memref<8x2x32xf32, #tpu.memory_space<vmem>>, vector<1x2x32xf32>,
    %c4_i32 = arith.constant 4 : i32
    %150 = arith.index_cast %c4_i32 : i32 to index
    %c0_38 = arith.constant 0 : index
    %c0_39 = arith.constant 0 : index
    %151 = vector.load %arg1[%150, %c0_38, %c0_39] : memref<8x2x96xf32, #tpu.memory_space<vmem>>, vector<1x2x96xf32>
    %152 = vector.shape_cast %151 : vector<1x2x96xf32> to vector<2x96xf32>
    %cst_40 = arith.constant dense<0.000000e+00> : vector<2x96xf32>
    %153 = tpu.matmul %145, %3, %cst_40 {dimension_numbers = #tpu.dot_dimension_numbers<[1], [0], [0], [1], [0, 0, 1, 1], [], []>} : vector<2x32xf32>, vector<32x96xf32>, vector<2x96xf32> -> vector<2x96xf32>
    %154 = vector.broadcast %4 : vector<1x96xf32> to vector<2x96xf32>
    %155 = arith.addf %153, %154 : vector<2x96xf32>
    %156 = vector.extract_strided_slice %152 {offsets = [0, 0], sizes = [2, 32], strides = [1, 1]} : vector<2x96xf32> to vector<2x32xf32>
    %157 = vector.extract_strided_slice %155 {offsets = [0, 0], sizes = [2, 32], strides = [1, 1]} : vector<2x96xf32> to vector<2x32xf32>
    %158 = arith.addf %156, %157 : vector<2x32xf32>
    %159 = arith.negf %158 : vector<2x32xf32>
    %160 = math.exp %159 : vector<2x32xf32>
    %cst_41 = arith.constant 1.000000e+00 : f32
    %161 = vector.broadcast %cst_41 : f32 to vector<2x32xf32>
    %162 = arith.addf %161, %160 : vector<2x32xf32>
    %163 = arith.divf %161, %162 : vector<2x32xf32>
    %164 = vector.extract_strided_slice %152 {offsets = [0, 32], sizes = [2, 32], strides = [1, 1]} : vector<2x96xf32> to vector<2x32xf32>
    %165 = vector.extract_strided_slice %155 {offsets = [0, 32], sizes = [2, 32], strides = [1, 1]} : vector<2x96xf32> to vector<2x32xf32>
    %166 = arith.addf %164, %165 : vector<2x32xf32>
    %167 = arith.negf %166 : vector<2x32xf32>
    %168 = math.exp %167 : vector<2x32xf32>
    %cst_42 = arith.constant 1.000000e+00 : f32
    %169 = vector.broadcast %cst_42 : f32 to vector<2x32xf32>
    %170 = arith.addf %169, %168 : vector<2x32xf32>
    %171 = arith.divf %169, %170 : vector<2x32xf32>
    %172 = vector.extract_strided_slice %152 {offsets = [0, 64], sizes = [2, 32], strides = [1, 1]} : vector<2x96xf32> to vector<2x32xf32>
    %173 = vector.extract_strided_slice %155 {offsets = [0, 64], sizes = [2, 32], strides = [1, 1]} : vector<2x96xf32> to vector<2x32xf32>
    %174 = arith.mulf %163, %173 : vector<2x32xf32>
    %175 = arith.addf %172, %174 : vector<2x32xf32>
    %176 = math.tanh %175 : vector<2x32xf32>
    %cst_43 = arith.constant 1.000000e+00 : f32
    %177 = vector.broadcast %cst_43 : f32 to vector<2x32xf32>
    %178 = arith.subf %177, %171 : vector<2x32xf32>
    %179 = arith.mulf %178, %176 : vector<2x32xf32>
    %180 = arith.mulf %171, %145 : vector<2x32xf32>
    %181 = arith.addf %179, %180 : vector<2x32xf32>
    %182 = arith.index_cast %c4_i32 : i32 to index
    %c0_44 = arith.constant 0 : index
    %c0_45 = arith.constant 0 : index
    %183 = vector.load %arg4[%182, %c0_44, %c0_45] : memref<8x2x32xf32, #tpu.memory_space<vmem>>, vector<1x2x32xf32>
    %184 = vector.shape_cast %183 : vector<1x2x32xf32> to vector<2x32xf32>
    %185 = vector.shape_cast %181 : vector<2x32xf32> to vector<1x2x32xf32>
    tpu.vector_store %arg4[%182, %c0_44, %c0_45], %185 {strides = array<i32>} : memref<8x2x32xf32, #tpu.memory_space<vmem>>, vector<1x2x32xf32>,
    %c5_i32 = arith.constant 5 : i32
    %186 = arith.index_cast %c5_i32 : i32 to index
    %c0_46 = arith.constant 0 : index
    %c0_47 = arith.constant 0 : index
    %187 = vector.load %arg1[%186, %c0_46, %c0_47] : memref<8x2x96xf32, #tpu.memory_space<vmem>>, vector<1x2x96xf32>
    %188 = vector.shape_cast %187 : vector<1x2x96xf32> to vector<2x96xf32>
    %cst_48 = arith.constant dense<0.000000e+00> : vector<2x96xf32>
    %189 = tpu.matmul %181, %3, %cst_48 {dimension_numbers = #tpu.dot_dimension_numbers<[1], [0], [0], [1], [0, 0, 1, 1], [], []>} : vector<2x32xf32>, vector<32x96xf32>, vector<2x96xf32> -> vector<2x96xf32>
    %190 = vector.broadcast %4 : vector<1x96xf32> to vector<2x96xf32>
    %191 = arith.addf %189, %190 : vector<2x96xf32>
    %192 = vector.extract_strided_slice %188 {offsets = [0, 0], sizes = [2, 32], strides = [1, 1]} : vector<2x96xf32> to vector<2x32xf32>
    %193 = vector.extract_strided_slice %191 {offsets = [0, 0], sizes = [2, 32], strides = [1, 1]} : vector<2x96xf32> to vector<2x32xf32>
    %194 = arith.addf %192, %193 : vector<2x32xf32>
    %195 = arith.negf %194 : vector<2x32xf32>
    %196 = math.exp %195 : vector<2x32xf32>
    %cst_49 = arith.constant 1.000000e+00 : f32
    %197 = vector.broadcast %cst_49 : f32 to vector<2x32xf32>
    %198 = arith.addf %197, %196 : vector<2x32xf32>
    %199 = arith.divf %197, %198 : vector<2x32xf32>
    %200 = vector.extract_strided_slice %188 {offsets = [0, 32], sizes = [2, 32], strides = [1, 1]} : vector<2x96xf32> to vector<2x32xf32>
    %201 = vector.extract_strided_slice %191 {offsets = [0, 32], sizes = [2, 32], strides = [1, 1]} : vector<2x96xf32> to vector<2x32xf32>
    %202 = arith.addf %200, %201 : vector<2x32xf32>
    %203 = arith.negf %202 : vector<2x32xf32>
    %204 = math.exp %203 : vector<2x32xf32>
    %cst_50 = arith.constant 1.000000e+00 : f32
    %205 = vector.broadcast %cst_50 : f32 to vector<2x32xf32>
    %206 = arith.addf %205, %204 : vector<2x32xf32>
    %207 = arith.divf %205, %206 : vector<2x32xf32>
    %208 = vector.extract_strided_slice %188 {offsets = [0, 64], sizes = [2, 32], strides = [1, 1]} : vector<2x96xf32> to vector<2x32xf32>
    %209 = vector.extract_strided_slice %191 {offsets = [0, 64], sizes = [2, 32], strides = [1, 1]} : vector<2x96xf32> to vector<2x32xf32>
    %210 = arith.mulf %199, %209 : vector<2x32xf32>
    %211 = arith.addf %208, %210 : vector<2x32xf32>
    %212 = math.tanh %211 : vector<2x32xf32>
    %cst_51 = arith.constant 1.000000e+00 : f32
    %213 = vector.broadcast %cst_51 : f32 to vector<2x32xf32>
    %214 = arith.subf %213, %207 : vector<2x32xf32>
    %215 = arith.mulf %214, %212 : vector<2x32xf32>
    %216 = arith.mulf %207, %181 : vector<2x32xf32>
    %217 = arith.addf %215, %216 : vector<2x32xf32>
    %218 = arith.index_cast %c5_i32 : i32 to index
    %c0_52 = arith.constant 0 : index
    %c0_53 = arith.constant 0 : index
    %219 = vector.load %arg4[%218, %c0_52, %c0_53] : memref<8x2x32xf32, #tpu.memory_space<vmem>>, vector<1x2x32xf32>
    %220 = vector.shape_cast %219 : vector<1x2x32xf32> to vector<2x32xf32>
    %221 = vector.shape_cast %217 : vector<2x32xf32> to vector<1x2x32xf32>
    tpu.vector_store %arg4[%218, %c0_52, %c0_53], %221 {strides = array<i32>} : memref<8x2x32xf32, #tpu.memory_space<vmem>>, vector<1x2x32xf32>,
    %c6_i32 = arith.constant 6 : i32
    %222 = arith.index_cast %c6_i32 : i32 to index
    %c0_54 = arith.constant 0 : index
    %c0_55 = arith.constant 0 : index
    %223 = vector.load %arg1[%222, %c0_54, %c0_55] : memref<8x2x96xf32, #tpu.memory_space<vmem>>, vector<1x2x96xf32>
    %224 = vector.shape_cast %223 : vector<1x2x96xf32> to vector<2x96xf32>
    %cst_56 = arith.constant dense<0.000000e+00> : vector<2x96xf32>
    %225 = tpu.matmul %217, %3, %cst_56 {dimension_numbers = #tpu.dot_dimension_numbers<[1], [0], [0], [1], [0, 0, 1, 1], [], []>} : vector<2x32xf32>, vector<32x96xf32>, vector<2x96xf32> -> vector<2x96xf32>
    %226 = vector.broadcast %4 : vector<1x96xf32> to vector<2x96xf32>
    %227 = arith.addf %225, %226 : vector<2x96xf32>
    %228 = vector.extract_strided_slice %224 {offsets = [0, 0], sizes = [2, 32], strides = [1, 1]} : vector<2x96xf32> to vector<2x32xf32>
    %229 = vector.extract_strided_slice %227 {offsets = [0, 0], sizes = [2, 32], strides = [1, 1]} : vector<2x96xf32> to vector<2x32xf32>
    %230 = arith.addf %228, %229 : vector<2x32xf32>
    %231 = arith.negf %230 : vector<2x32xf32>
    %232 = math.exp %231 : vector<2x32xf32>
    %cst_57 = arith.constant 1.000000e+00 : f32
    %233 = vector.broadcast %cst_57 : f32 to vector<2x32xf32>
    %234 = arith.addf %233, %232 : vector<2x32xf32>
    %235 = arith.divf %233, %234 : vector<2x32xf32>
    %236 = vector.extract_strided_slice %224 {offsets = [0, 32], sizes = [2, 32], strides = [1, 1]} : vector<2x96xf32> to vector<2x32xf32>
    %237 = vector.extract_strided_slice %227 {offsets = [0, 32], sizes = [2, 32], strides = [1, 1]} : vector<2x96xf32> to vector<2x32xf32>
    %238 = arith.addf %236, %237 : vector<2x32xf32>
    %239 = arith.negf %238 : vector<2x32xf32>
    %240 = math.exp %239 : vector<2x32xf32>
    %cst_58 = arith.constant 1.000000e+00 : f32
    %241 = vector.broadcast %cst_58 : f32 to vector<2x32xf32>
    %242 = arith.addf %241, %240 : vector<2x32xf32>
    %243 = arith.divf %241, %242 : vector<2x32xf32>
    %244 = vector.extract_strided_slice %224 {offsets = [0, 64], sizes = [2, 32], strides = [1, 1]} : vector<2x96xf32> to vector<2x32xf32>
    %245 = vector.extract_strided_slice %227 {offsets = [0, 64], sizes = [2, 32], strides = [1, 1]} : vector<2x96xf32> to vector<2x32xf32>
    %246 = arith.mulf %235, %245 : vector<2x32xf32>
    %247 = arith.addf %244, %246 : vector<2x32xf32>
    %248 = math.tanh %247 : vector<2x32xf32>
    %cst_59 = arith.constant 1.000000e+00 : f32
    %249 = vector.broadcast %cst_59 : f32 to vector<2x32xf32>
    %250 = arith.subf %249, %243 : vector<2x32xf32>
    %251 = arith.mulf %250, %248 : vector<2x32xf32>
    %252 = arith.mulf %243, %217 : vector<2x32xf32>
    %253 = arith.addf %251, %252 : vector<2x32xf32>
    %254 = arith.index_cast %c6_i32 : i32 to index
    %c0_60 = arith.constant 0 : index
    %c0_61 = arith.constant 0 : index
    %255 = vector.load %arg4[%254, %c0_60, %c0_61] : memref<8x2x32xf32, #tpu.memory_space<vmem>>, vector<1x2x32xf32>
    %256 = vector.shape_cast %255 : vector<1x2x32xf32> to vector<2x32xf32>
    %257 = vector.shape_cast %253 : vector<2x32xf32> to vector<1x2x32xf32>
    tpu.vector_store %arg4[%254, %c0_60, %c0_61], %257 {strides = array<i32>} : memref<8x2x32xf32, #tpu.memory_space<vmem>>, vector<1x2x32xf32>,
    %c7_i32 = arith.constant 7 : i32
    %258 = arith.index_cast %c7_i32 : i32 to index
    %c0_62 = arith.constant 0 : index
    %c0_63 = arith.constant 0 : index
    %259 = vector.load %arg1[%258, %c0_62, %c0_63] : memref<8x2x96xf32, #tpu.memory_space<vmem>>, vector<1x2x96xf32>
    %260 = vector.shape_cast %259 : vector<1x2x96xf32> to vector<2x96xf32>
    %cst_64 = arith.constant dense<0.000000e+00> : vector<2x96xf32>
    %261 = tpu.matmul %253, %3, %cst_64 {dimension_numbers = #tpu.dot_dimension_numbers<[1], [0], [0], [1], [0, 0, 1, 1], [], []>} : vector<2x32xf32>, vector<32x96xf32>, vector<2x96xf32> -> vector<2x96xf32>
    %262 = vector.broadcast %4 : vector<1x96xf32> to vector<2x96xf32>
    %263 = arith.addf %261, %262 : vector<2x96xf32>
    %264 = vector.extract_strided_slice %260 {offsets = [0, 0], sizes = [2, 32], strides = [1, 1]} : vector<2x96xf32> to vector<2x32xf32>
    %265 = vector.extract_strided_slice %263 {offsets = [0, 0], sizes = [2, 32], strides = [1, 1]} : vector<2x96xf32> to vector<2x32xf32>
    %266 = arith.addf %264, %265 : vector<2x32xf32>
    %267 = arith.negf %266 : vector<2x32xf32>
    %268 = math.exp %267 : vector<2x32xf32>
    %cst_65 = arith.constant 1.000000e+00 : f32
    %269 = vector.broadcast %cst_65 : f32 to vector<2x32xf32>
    %270 = arith.addf %269, %268 : vector<2x32xf32>
    %271 = arith.divf %269, %270 : vector<2x32xf32>
    %272 = vector.extract_strided_slice %260 {offsets = [0, 32], sizes = [2, 32], strides = [1, 1]} : vector<2x96xf32> to vector<2x32xf32>
    %273 = vector.extract_strided_slice %263 {offsets = [0, 32], sizes = [2, 32], strides = [1, 1]} : vector<2x96xf32> to vector<2x32xf32>
    %274 = arith.addf %272, %273 : vector<2x32xf32>
    %275 = arith.negf %274 : vector<2x32xf32>
    %276 = math.exp %275 : vector<2x32xf32>
    %cst_66 = arith.constant 1.000000e+00 : f32
    %277 = vector.broadcast %cst_66 : f32 to vector<2x32xf32>
    %278 = arith.addf %277, %276 : vector<2x32xf32>
    %279 = arith.divf %277, %278 : vector<2x32xf32>
    %280 = vector.extract_strided_slice %260 {offsets = [0, 64], sizes = [2, 32], strides = [1, 1]} : vector<2x96xf32> to vector<2x32xf32>
    %281 = vector.extract_strided_slice %263 {offsets = [0, 64], sizes = [2, 32], strides = [1, 1]} : vector<2x96xf32> to vector<2x32xf32>
    %282 = arith.mulf %271, %281 : vector<2x32xf32>
    %283 = arith.addf %280, %282 : vector<2x32xf32>
    %284 = math.tanh %283 : vector<2x32xf32>
    %cst_67 = arith.constant 1.000000e+00 : f32
    %285 = vector.broadcast %cst_67 : f32 to vector<2x32xf32>
    %286 = arith.subf %285, %279 : vector<2x32xf32>
    %287 = arith.mulf %286, %284 : vector<2x32xf32>
    %288 = arith.mulf %279, %253 : vector<2x32xf32>
    %289 = arith.addf %287, %288 : vector<2x32xf32>
    %290 = arith.index_cast %c7_i32 : i32 to index
    %c0_68 = arith.constant 0 : index
    %c0_69 = arith.constant 0 : index
    %291 = vector.load %arg4[%290, %c0_68, %c0_69] : memref<8x2x32xf32, #tpu.memory_space<vmem>>, vector<1x2x32xf32>
    %292 = vector.shape_cast %291 : vector<1x2x32xf32> to vector<2x32xf32>
    %293 = vector.shape_cast %289 : vector<2x32xf32> to vector<1x2x32xf32>
    tpu.vector_store %arg4[%290, %c0_68, %c0_69], %293 {strides = array<i32>} : memref<8x2x32xf32, #tpu.memory_space<vmem>>, vector<1x2x32xf32>,
    %c8_i32 = arith.constant 8 : i32
    %c0_70 = arith.constant 0 : index
    %c0_71 = arith.constant 0 : index
    %294 = vector.load %arg6[%c0_70, %c0_71] : memref<2x32xf32, #tpu.memory_space<vmem>>, vector<2x32xf32>
    tpu.vector_store %arg6[%c0_70, %c0_71], %289 {strides = array<i32>} : memref<2x32xf32, #tpu.memory_space<vmem>>, vector<2x32xf32>,
    %c0_i32_72 = arith.constant 0 : i32
    %295 = arith.cmpi eq, %arg0, %c0_i32_72 : i32
    %296 = arith.extui %295 : i1 to i32
    %c0_i32_73 = arith.constant 0 : i32
    %297 = arith.cmpi ne, %296, %c0_i32_73 : i32
    scf.if %297 {
      %c0_74 = arith.constant 0 : index
      %c0_75 = arith.constant 0 : index
      %298 = vector.load %arg5[%c0_74, %c0_75] : memref<2x32xf32, #tpu.memory_space<vmem>>, vector<2x32xf32>
      tpu.vector_store %arg5[%c0_74, %c0_75], %289 {strides = array<i32>} : memref<2x32xf32, #tpu.memory_space<vmem>>, vector<2x32xf32>,
    } else {
    }
    return
  }
  func.func @transform_0(%arg0: i32) -> (i32, i32, i32) {
    %c0_i32 = arith.constant 0 : i32
    %c0_i32_0 = arith.constant 0 : i32
    %c0_i32_1 = arith.constant 0 : i32
    return %arg0, %c0_i32, %c0_i32_0 : i32, i32, i32
  }
  func.func @transform_1(%arg0: i32) -> (i32, i32) {
    %c0_i32 = arith.constant 0 : i32
    %c0_i32_0 = arith.constant 0 : i32
    %c0_i32_1 = arith.constant 0 : i32
    return %c0_i32, %c0_i32_0 : i32, i32
  }
  func.func @transform_2(%arg0: i32) -> (i32, i32) {
    %c0_i32 = arith.constant 0 : i32
    %c0_i32_0 = arith.constant 0 : i32
    %c0_i32_1 = arith.constant 0 : i32
    return %c0_i32, %c0_i32_0 : i32, i32
  }
  func.func @transform_3(%arg0: i32) -> (i32, i32, i32) {
    %c0_i32 = arith.constant 0 : i32
    %c0_i32_0 = arith.constant 0 : i32
    %c0_i32_1 = arith.constant 0 : i32
    return %arg0, %c0_i32, %c0_i32_0 : i32, i32, i32
  }
  func.func @transform_4(%arg0: i32) -> (i32, i32) {
    %c0_i32 = arith.constant 0 : i32
    %c0_i32_0 = arith.constant 0 : i32
    %c0_i32_1 = arith.constant 0 : i32
    return %c0_i32, %c0_i32_0 : i32, i32
  }
}

module attributes {stable_mosaic.version = 11 : i64} {
  func.func @output_mlp_kernel(%arg0: i32, %arg1: memref<16x32xf32, #tpu.memory_space<vmem>>, %arg2: memref<32x32xf32, #tpu.memory_space<vmem>>, %arg3: memref<1x32xf32, #tpu.memory_space<vmem>>, %arg4: memref<32x16xf32, #tpu.memory_space<vmem>>, %arg5: memref<1x16xf32, #tpu.memory_space<vmem>>, %arg6: memref<16x16xf32, #tpu.memory_space<vmem>>) attributes {dimension_semantics = [#tpu.dimension_semantics<parallel>], iteration_bounds = array<i64: 1>, scalar_prefetch = 0 : i64, scratch_operands = 0 : i64, tpu.core_type = #tpu.core_type<tc>, window_params = [{transform_indices = @transform_0, window_bounds = array<i64: 16, 32>}, {pipeline_mode = #tpu.pipeline_mode<synchronous>, transform_indices = @transform_1, window_bounds = array<i64: 32, 32>}, {pipeline_mode = #tpu.pipeline_mode<synchronous>, transform_indices = @transform_2, window_bounds = array<i64: 1, 32>}, {pipeline_mode = #tpu.pipeline_mode<synchronous>, transform_indices = @transform_3, window_bounds = array<i64: 32, 16>}, {pipeline_mode = #tpu.pipeline_mode<synchronous>, transform_indices = @transform_4, window_bounds = array<i64: 1, 16>}, {transform_indices = @transform_5, window_bounds = array<i64: 16, 16>}]} {
    %c0 = arith.constant 0 : index
    %c0_0 = arith.constant 0 : index
    %0 = vector.load %arg1[%c0, %c0_0] : memref<16x32xf32, #tpu.memory_space<vmem>>, vector<16x32xf32>
    %c0_1 = arith.constant 0 : index
    %c0_2 = arith.constant 0 : index
    %1 = vector.load %arg2[%c0_1, %c0_2] : memref<32x32xf32, #tpu.memory_space<vmem>>, vector<32x32xf32>
    %cst = arith.constant dense<0.000000e+00> : vector<16x32xf32>
    %2 = tpu.matmul %0, %1, %cst {dimension_numbers = #tpu.dot_dimension_numbers<[1], [0], [0], [1], [0, 0, 1, 1], [], []>} : vector<16x32xf32>, vector<32x32xf32>, vector<16x32xf32> -> vector<16x32xf32>
    %c0_3 = arith.constant 0 : index
    %c0_4 = arith.constant 0 : index
    %3 = vector.load %arg3[%c0_3, %c0_4] : memref<1x32xf32, #tpu.memory_space<vmem>>, vector<1x32xf32>
    %4 = vector.broadcast %3 : vector<1x32xf32> to vector<16x32xf32>
    %5 = arith.addf %2, %4 : vector<16x32xf32>
    %cst_5 = arith.constant 0.000000e+00 : f32
    %6 = vector.broadcast %cst_5 : f32 to vector<16x32xf32>
    %7 = arith.maximumf %5, %6 : vector<16x32xf32>
    %c0_6 = arith.constant 0 : index
    %c0_7 = arith.constant 0 : index
    %8 = vector.load %arg4[%c0_6, %c0_7] : memref<32x16xf32, #tpu.memory_space<vmem>>, vector<32x16xf32>
    %cst_8 = arith.constant dense<0.000000e+00> : vector<16x16xf32>
    %9 = tpu.matmul %7, %8, %cst_8 {dimension_numbers = #tpu.dot_dimension_numbers<[1], [0], [0], [1], [0, 0, 1, 1], [], []>} : vector<16x32xf32>, vector<32x16xf32>, vector<16x16xf32> -> vector<16x16xf32>
    %c0_9 = arith.constant 0 : index
    %c0_10 = arith.constant 0 : index
    %10 = vector.load %arg5[%c0_9, %c0_10] : memref<1x16xf32, #tpu.memory_space<vmem>>, vector<1x16xf32>
    %11 = vector.broadcast %10 : vector<1x16xf32> to vector<16x16xf32>
    %12 = arith.addf %9, %11 : vector<16x16xf32>
    %c0_11 = arith.constant 0 : index
    %c0_12 = arith.constant 0 : index
    %13 = vector.load %arg6[%c0_11, %c0_12] : memref<16x16xf32, #tpu.memory_space<vmem>>, vector<16x16xf32>
    tpu.vector_store %arg6[%c0_11, %c0_12], %12 {strides = array<i32>} : memref<16x16xf32, #tpu.memory_space<vmem>>, vector<16x16xf32>,
    return
  }
  func.func @transform_0(%arg0: i32) -> (i32, i32) {
    %c0_i32 = arith.constant 0 : i32
    %c0_i32_0 = arith.constant 0 : i32
    return %arg0, %c0_i32 : i32, i32
  }
  func.func @transform_1(%arg0: i32) -> (i32, i32) {
    %c0_i32 = arith.constant 0 : i32
    %c0_i32_0 = arith.constant 0 : i32
    %c0_i32_1 = arith.constant 0 : i32
    return %c0_i32, %c0_i32_0 : i32, i32
  }
  func.func @transform_2(%arg0: i32) -> (i32, i32) {
    %c0_i32 = arith.constant 0 : i32
    %c0_i32_0 = arith.constant 0 : i32
    %c0_i32_1 = arith.constant 0 : i32
    return %c0_i32, %c0_i32_0 : i32, i32
  }
  func.func @transform_3(%arg0: i32) -> (i32, i32) {
    %c0_i32 = arith.constant 0 : i32
    %c0_i32_0 = arith.constant 0 : i32
    %c0_i32_1 = arith.constant 0 : i32
    return %c0_i32, %c0_i32_0 : i32, i32
  }
  func.func @transform_4(%arg0: i32) -> (i32, i32) {
    %c0_i32 = arith.constant 0 : i32
    %c0_i32_0 = arith.constant 0 : i32
    %c0_i32_1 = arith.constant 0 : i32
    return %c0_i32, %c0_i32_0 : i32, i32
  }
  func.func @transform_5(%arg0: i32) -> (i32, i32) {
    %c0_i32 = arith.constant 0 : i32
    %c0_i32_0 = arith.constant 0 : i32
    return %arg0, %c0_i32 : i32, i32
  }
}

</mosaic_0001>

<bundles_post_ra>
// kernel: gru_plain_forward.7
= control target key start
LH: loop header
LB: loop body
LE: loop exit
PB: predicated region body
PF: predicated region fallthrough
CT: control target
= control target key end

     0   :  { %vm27_vm0 = vcmask 261120   ;;  %vm109_vm1 = vcmask 785408   ;;  %s191_s1 = inlined_call_operand.vmem [shape: f32[32,96], index: 1, kind: input, shape index: {}]   ;;  %s192_s0 = inlined_call_operand.vmem [shape: f32[16,32], index: 0, kind: input, shape index: {}]   ;;  %s193_s2 = inlined_call_operand.vmem [shape: f32[1,96], index: 2, kind: input, shape index: {}]   ;;  %s194_s3 = inlined_call_operand.vmem [shape: f32[16,96], index: 3, kind: output, shape index: {}]  }
   0x1   :  { %v16_v0 = vld [vmem:[%s191_s1] sm:$0xff]  ;;  %v17_v1 = vld [vmem:[%s191_s1 + $0x8] sm:$0xff]  ;;  %v18_v2 = vld [vmem:[%s191_s1 + $0x10] sm:$0xff] }
   0x2   :  { %v136_v3 = vpack.c.bf16 %v17_v1, %v16_v0  ;;  %v19_v4 = vld [vmem:[%s191_s1 + $0x18] sm:$0xff]  ;;  %v14_v5 = vld [vmem:[%s192_s0] sm:$0xff]  ;;  %v15_v7 = vld [vmem:[%s192_s0 + $0x8] sm:$0xff] }
   0x3   :  { %v140_v6 = vpack.c.bf16 %v19_v4, %v18_v2  ;;  %133 = vmatprep.mubr.msk.f32.mxu0 %vm27_vm0, %v14_v5  ;;  %v116_v8 = vld [vmem:[%s193_s2] ss:$0 sm:$0xff] }
   0x4   :  { %137 = vmatprep.subr.bf16.mxu0 %v136_v3 }
   0x5   :  { %139 = vmatpush3.bf16.msra.mxu0 %v136_v3 }
   0x6   :  { %141 = vmatprep.subr.bf16.mxu0 %v140_v6 }
   0x9   :  { %143 = vmatpush3.bf16.msra.mxu0 %v140_v6 }
   0xc   :  { %134 = vmatmul.mubr.msk.f32.vlgmr.msra.gmra.mrb[0].mxu0 %vm27_vm0, %v15_v7 }
  0xdf   :  { %v135_v9 = vpop.f32.mrb[0].mxu0 }
  0xe0   :  { %v106_v10 = vadd.f32 %v135_v9, %v116_v8  ;;  %v100_v11 = vpop.f32.mrb[1].mxu0 }
  0xe1   :  { %v101_v12 = vadd.f32 %v116_v8, %v100_v11 }
  0xe2   :  { %111 = vst.msk [vmem:[%s194_s3 + $0x8] sm:$0xff] %vm109_vm1, %v106_v10 }
  0xe3   :  { %110 = vst.msk [vmem:[%s194_s3] sm:$0xff] %vm109_vm1, %v101_v12 }

// kernel: gru_plain_forward.5
= control target key start
LH: loop header
LB: loop body
LE: loop exit
PB: predicated region body
PF: predicated region fallthrough
CT: control target
= control target key end

     0   :  { %vm31_vm0 = vcmask 130048   ;;  %vm126_vm1 = vcmask 261120   ;;  %vm208_vm2 = vcmask 785408   ;;  %s327_s1 = inlined_call_operand.vmem [shape: f32[16,32], index: 1, kind: input, shape index: {}]   ;;  %s328_s0 = inlined_call_operand.vmem [shape: f32[16,16], index: 0, kind: input, shape index: {}]   ;;  %s329_s3 = inlined_call_operand.vmem [shape: f32[32,96], index: 3, kind: input, shape index: {}]   ;;  %s330_s2 = inlined_call_operand.vmem [shape: f32[1,32], index: 2, kind: input, shape index: {}]   ;;  %s331_s4 = inlined_call_operand.vmem [shape: f32[1,96], index: 4, kind: input, shape index: {}]   ;;  %s332_s5 = inlined_call_operand.vmem [shape: f32[16,96], index: 5, kind: output, shape index: {}]  }
   0x1   :  { %v22_v0 = vld [vmem:[%s327_s1] sm:$0xff]  ;;  %v23_v1 = vld [vmem:[%s327_s1 + $0x8] sm:$0xff]  ;;  %v117_v8 = vld [vmem:[%s329_s3 + $0x10] sm:$0xff] }
   0x2   :  { %v20_v2 = vld [vmem:[%s328_s0] sm:$0xff]  ;;  %v249_v3 = vpack.c.bf16 %v23_v1, %v22_v0  ;;  %v116_v5 = vld [vmem:[%s329_s3 + $0x8] sm:$0xff]  ;;  %v118_v9 = vld [vmem:[%s329_s3 + $0x18] sm:$0xff] }
   0x3   :  { %235 = vmatprep.mubr.msk.f32.mxu0 %vm31_vm0, %v20_v2  ;;  %v115_v4 = vld [vmem:[%s329_s3] sm:$0xff]  ;;  %v21_v7 = vld [vmem:[%s328_s0 + $0x8] sm:$0xff]  ;;  %v257_v10 = vpack.c.bf16 %v118_v9, %v117_v8 }
   0x4   :  { %v253_v6 = vpack.c.bf16 %v116_v5, %v115_v4  ;;  %250 = vmatprep.subr.bf16.mxu0 %v249_v3  ;;  %v215_v11 = vld [vmem:[%s330_s2] ss:$0 sm:$0xff] }
   0x5   :  { %252 = vmatpush3.bf16.msra.mxu0 %v249_v3  ;;  %v218_v18 = vld [vmem:[%s331_s4] ss:$0 sm:$0xff] }
   0x6   :  { %254 = vmatprep.subr.bf16.mxu1 %v253_v6 }
   0x7   :  { %256 = vmatpush3.bf16.msra.mxu1 %v253_v6 }
   0x8   :  { %236 = vmatmul.mubr.msk.f32.vlgmr.msra.gmra.mrb[0].mxu0 %vm31_vm0, %v21_v7  ;;  %258 = vmatprep.subr.bf16.mxu1 %v257_v10 }
   0xb   :  { %260 = vmatpush3.bf16.msra.mxu1 %v257_v10 }
  0xdb   :  { %v237_v12 = vpop.f32.mrb[0].mxu0 }
  0xdc   :  { %v110_v13 = vadd.f32 %v237_v12, %v215_v11  ;;  %v104_v14 = vpop.f32.mrb[1].mxu0 }
  0xdd   :  { %v105_v15 = vadd.f32 %v215_v11, %v104_v14 }
  0xde   :  { %v114_v17 = vmax.f32 %v110_v13, 0.0 }
  0xdf   :  { %v113_v16 = vmax.f32 %v105_v15, 0.0 }
  0xe1   :  { %246 = vmatprep.mubr.msk.f32.mxu1 %vm126_vm1, %v113_v16 }
  0xe2   :  { %247 = vmatmul.mubr.msk.f32.vlgmr.msra.gmra.mrb[0].mxu1 %vm126_vm1, %v114_v17 }
 0x1b5   :  { %v248_v19 = vpop.f32.mrb[0].mxu1 }
 0x1b6   :  { %v205_v20 = vadd.f32 %v248_v19, %v218_v18  ;;  %v199_v21 = vpop.f32.mrb[1].mxu1 }
 0x1b7   :  { %v200_v22 = vadd.f32 %v218_v18, %v199_v21 }
 0x1b8   :  { %210 = vst.msk [vmem:[%s332_s5 + $0x8] sm:$0xff] %vm208_vm2, %v205_v20 }
 0x1b9   :  { %209 = vst.msk [vmem:[%s332_s5] sm:$0xff] %vm208_vm2, %v200_v22 }

// kernel: gru_plain_forward.6
= control target key start
LH: loop header
LB: loop body
LE: loop exit
PB: predicated region body
PF: predicated region fallthrough
CT: control target
= control target key end

     0   :  { %vm20_vm0 = vcmask 254976   ;;  %v1160_v0 = vmov 0.0|0.0   ;;  %vm1161_vm1 = vmmov 0   ;;  %v1162_v4 = vmov 0.0   ;;  %s1163_s24 = smov 64   ;;  %s1165_s27 = smov 32   ;;  %s1371_s1 = inlined_call_operand.vmem [shape: f32[32,96], index: 1, kind: input, shape index: {}]   ;;  %s1372_s2 = inlined_call_operand.vmem [shape: f32[1,96], index: 2, kind: input, shape index: {}]   ;;  %s1373_s0 = inlined_call_operand.vmem [shape: f32[8,2,96], index: 0, kind: input, shape index: {}]   ;;  %s1374_s3 = inlined_call_operand.vmem [shape: f32[8,2,32], index: 3, kind: output, shape index: {0}]   ;;  %s1375_s4 = inlined_call_operand.vmem [shape: f32[2,32], index: 4, kind: output, shape index: {1}]  }
   0x1   :  { %1058 = vmatprep.subr.bf16.mxu0 %v1160_v0  ;;  %v22_v1 = vld [vmem:[%s1371_s1] sm:$0xff]  ;;  %v23_v2 = vld [vmem:[%s1371_s1 + $0x8] sm:$0xff]  ;;  %v24_v3 = vld [vmem:[%s1371_s1 + $0x10] sm:$0xff]  ;;  %978 = vmatprep.mubr.msk.f32.mxu0 %vm1161_vm1, %v1162_v4  ;;  %21 = vst.msk [vmem:[#allocation2] sm:$0x3] %vm20_vm0, %v1162_v4  ;;  %vm35_vm2 = vcmask 261120  }
   0x2   :  { %v1205_v5 = vpack.c.bf16 %v23_v2, %v22_v1  ;;  %v25_v6 = vld [vmem:[%s1371_s1 + $0x18] sm:$0xff]  ;;  %1064 = vmatprep.subr.bf16.mxu1 %v1160_v0  ;;  %989 = vmatprep.mubr.msk.f32.mxu1 %vm1161_vm1, %v1162_v4  ;;  %v1233_v9 = vld [vmem:[%s1372_s2] ss:$0 sm:$0xff]  ;;  %s1164_s2 = smov 96   ;;  %v902_v34 = vld [vmem:[%s1373_s0 + $0x2] sm:$0x3] }
   0x3   :  { %v1214_v7 = vpack.c.bf16 %v25_v6, %v24_v3  ;;  %v28_v13 = vld [vmem:[%s1373_s0] sm:$0x3]  ;;  %v906_v54 = vld [vmem:[%s1373_s0 + $0x4] sm:$0x3] }
   0x4   :  { %1060 = vmatpush3.bf16.msra.mxu0 %v1205_v5  ;;  %1066 = vmatpush3.bf16.msra.mxu1 %v1205_v5 }
   0x5   :  { %1061 = vmatprep.subr.bf16.mxu0 %v1160_v0  ;;  %1067 = vmatprep.subr.bf16.mxu1 %v1160_v0 }
   0x8   :  { %1063 = vmatpush3.bf16.msra.mxu0 %v1214_v7  ;;  %v27_v8 = vld [vmem:[#allocation2] sm:$0x3]  ;;  %1069 = vmatpush3.bf16.msra.mxu1 %v1214_v7 }
   0x9   :  { %1070 = vmatprep.subr.bf16.mxu0 %v1160_v0  ;;  %1076 = vmatprep.subr.bf16.mxu1 %v1160_v0 }
   0xb   :  { %979 = vmatmul.mubr.msk.f32.vlgmr.msra.gmra.mrb[0].mxu0 %vm35_vm2, %v27_v8 }
   0xc   :  { %1072 = vmatpush3.bf16.msra.mxu0 %v1205_v5  ;;  %1000 = vmatprep.mubr.msk.f32.mxu0 %vm1161_vm1, %v1162_v4 }
   0xd   :  { %1073 = vmatprep.subr.bf16.mxu0 %v1160_v0 }
  0x10   :  { %1075 = vmatpush3.bf16.msra.mxu0 %v1214_v7 }
  0x11   :  { %1082 = vmatprep.subr.bf16.mxu0 %v1160_v0 }
  0xde   :  { %v105_v10 = vpop.f32.mrb[0].mxu0 }
  0xdf   :  { %v106_v11 = vadd.f32 %v1233_v9, %v105_v10  ;;  %v980_v12 = vpop.f32.mrb[1].mxu0 }
  0xe1   :  { %117 = vrot.lane.b32.xlu0 %v106_v11, %s1163_s24  ;;  %v109_v14 = vadd.f32 %v106_v11, %v28_v13 }
  0xe3   :  { %v901_v15 = vmul.f32 -1.442695, %v109_v14 }
  0xe5   :  { %1112 = vpow2.f32 %v901_v15  ;;  %v910_v15 = vld [vmem:[%s1373_s0 + $0x6] sm:$0x3] }
  0xef   :  { %v1113_v16 = vpop.eup %1112 }
  0xf0   :  { %v113_v17 = vadd.f32 1.0, %v1113_v16 }
  0xf2   :  { %1114 = vrcp.f32 %v113_v17 }
  0xfc   :  { %v1115_v18 = vpop.eup %1114 }
  0xfd   :  { %v127_v25 = vsub.f32 1.0, %v1115_v18 }
 0x153   :  { %v118_v19 = vpop.permute.xlu0 %117 }
 0x154   :  { %v120_v20 = vmul.f32 %v1115_v18, %v118_v19 }
 0x156   :  { %122 = vrot.lane.b32.xlu0 %v120_v20, %s1163_s24 }
 0x1c8   :  { %v123_v21 = vpop.permute.xlu0 %122 }
 0x1c9   :  { %v125_v22 = vadd.f32 %v123_v21, %v28_v13 }
 0x1cb   :  { %1116 = vtanh.f32 %v125_v22 }
 0x1d5   :  { %v1117_v23 = vpop.eup %1116 }
 0x1d6   :  { %129 = vrot.lane.b32.xlu1 %v1117_v23, %s1164_s2 }
 0x1da   :  { %133 = vrot.lane.b32.xlu1 %v27_v8, %s1165_s27 }
 0x248   :  { %v130_v24 = vpop.permute.xlu1 %129 }
 0x249   :  { %v132_v27 = vmul.f32 %v130_v24, %v127_v25 }
 0x24c   :  { %v134_v26 = vpop.permute.xlu1 %133 }
 0x24d   :  { %v136_v28 = vmul.f32 %v1115_v18, %v134_v26 }
 0x24f   :  { %v137_v29 = vadd.f32 %v136_v28, %v132_v27 }
 0x251   :  { %139 = vrot.lane.b32.xlu0 %v137_v29, %s1164_s2 }
 0x2c3   :  { %v140_v30 = vpop.permute.xlu0 %139 }
 0x2c4   :  { %143 = vst.msk [vmem:[%s1374_s3] sm:$0x3] %vm20_vm0, %v140_v30  ;;  %990 = vmatmul.mubr.msk.f32.vlgmr.msra.gmra.mrb[0].mxu1 %vm35_vm2, %v140_v30 }
 0x2c5   :  { %1078 = vmatpush3.bf16.msra.mxu1 %v1205_v5  ;;  %1011 = vmatprep.mubr.msk.f32.mxu1 %vm1161_vm1, %v1162_v4 }
 0x2c6   :  { %1079 = vmatprep.subr.bf16.mxu1 %v1160_v0 }
 0x2c9   :  { %1081 = vmatpush3.bf16.msra.mxu1 %v1214_v7 }
 0x2ca   :  { %1088 = vmatprep.subr.bf16.mxu1 %v1160_v0 }
 0x397   :  { %v214_v31 = vpop.f32.mrb[0].mxu1 }
 0x398   :  { %v215_v32 = vadd.f32 %v1233_v9, %v214_v31  ;;  %v991_v33 = vpop.f32.mrb[1].mxu1 }
 0x39a   :  { %226 = vrot.lane.b32.xlu1 %v215_v32, %s1163_s24  ;;  %v218_v35 = vadd.f32 %v902_v34, %v215_v32 }
 0x39c   :  { %v904_v36 = vmul.f32 -1.442695, %v218_v35  ;;  %v914_v35 = vld [vmem:[%s1373_s0 + $0x8] sm:$0x3] }
 0x39e   :  { %1118 = vpow2.f32 %v904_v36 }
 0x3a8   :  { %v1119_v37 = vpop.eup %1118 }
 0x3a9   :  { %v222_v38 = vadd.f32 1.0, %v1119_v37 }
 0x3ab   :  { %1120 = vrcp.f32 %v222_v38 }
 0x3b5   :  { %v1121_v39 = vpop.eup %1120 }
 0x3b6   :  { %v236_v45 = vsub.f32 1.0, %v1121_v39  ;;  %v242_v47 = vmul.f32 %v1121_v39, %v137_v29 }
 0x40c   :  { %v227_v40 = vpop.permute.xlu1 %226 }
 0x40d   :  { %v229_v41 = vmul.f32 %v1121_v39, %v227_v40 }
 0x40f   :  { %231 = vrot.lane.b32.xlu0 %v229_v41, %s1163_s24 }
 0x481   :  { %v232_v42 = vpop.permute.xlu0 %231 }
 0x482   :  { %v234_v43 = vadd.f32 %v902_v34, %v232_v42 }
 0x484   :  { %1122 = vtanh.f32 %v234_v43 }
 0x48e   :  { %v1123_v44 = vpop.eup %1122 }
 0x48f   :  { %238 = vrot.lane.b32.xlu1 %v1123_v44, %s1164_s2 }
 0x501   :  { %v239_v46 = vpop.permute.xlu1 %238 }
 0x502   :  { %v241_v48 = vmul.f32 %v239_v46, %v236_v45 }
 0x504   :  { %v243_v49 = vadd.f32 %v242_v47, %v241_v48 }
 0x506   :  { %245 = vrot.lane.b32.xlu0 %v243_v49, %s1164_s2 }
 0x578   :  { %v246_v50 = vpop.permute.xlu0 %245 }
 0x579   :  { %905 = vst.msk [vmem:[%s1374_s3 + $0x2] sm:$0x3] %vm20_vm0, %v246_v50  ;;  %1001 = vmatmul.mubr.msk.f32.vlgmr.msra.gmra.mrb[2].mxu0 %vm35_vm2, %v246_v50 }
 0x57a   :  { %1084 = vmatpush3.bf16.msra.mxu0 %v1205_v5  ;;  %1022 = vmatprep.mubr.msk.f32.mxu0 %vm1161_vm1, %v1162_v4 }
 0x57b   :  { %1085 = vmatprep.subr.bf16.mxu0 %v1160_v0 }
 0x57e   :  { %1087 = vmatpush3.bf16.msra.mxu0 %v1214_v7 }
 0x57f   :  { %1094 = vmatprep.subr.bf16.mxu0 %v1160_v0 }
 0x64c   :  { %v320_v51 = vpop.f32.mrb[2].mxu0 }
 0x64d   :  { %v321_v52 = vadd.f32 %v1233_v9, %v320_v51  ;;  %v1002_v53 = vpop.f32.mrb[3].mxu0 }
 0x64f   :  { %332 = vrot.lane.b32.xlu1 %v321_v52, %s1163_s24  ;;  %v324_v55 = vadd.f32 %v906_v54, %v321_v52 }
 0x651   :  { %v908_v56 = vmul.f32 -1.442695, %v324_v55  ;;  %v918_v55 = vld [vmem:[%s1373_s0 + $0xa] sm:$0x3] }
 0x653   :  { %1124 = vpow2.f32 %v908_v56 }
 0x65d   :  { %v1125_v57 = vpop.eup %1124 }
 0x65e   :  { %v328_v58 = vadd.f32 1.0, %v1125_v57 }
 0x660   :  { %1126 = vrcp.f32 %v328_v58 }
 0x66a   :  { %v1127_v59 = vpop.eup %1126 }
 0x66b   :  { %v342_v2 = vsub.f32 1.0, %v1127_v59  ;;  %v348_v6 = vmul.f32 %v1127_v59, %v243_v49 }
 0x6c1   :  { %v333_v60 = vpop.permute.xlu1 %332 }
 0x6c2   :  { %v335_v61 = vmul.f32 %v1127_v59, %v333_v60 }
 0x6c4   :  { %337 = vrot.lane.b32.xlu0 %v335_v61, %s1163_s24 }
 0x736   :  { %v338_v62 = vpop.permute.xlu0 %337 }
 0x737   :  { %v340_v63 = vadd.f32 %v906_v54, %v338_v62 }
 0x739   :  { %1128 = vtanh.f32 %v340_v63 }
 0x743   :  { %v1129_v1 = vpop.eup %1128 }
 0x744   :  { %344 = vrot.lane.b32.xlu1 %v1129_v1, %s1164_s2 }
 0x7b6   :  { %v345_v3 = vpop.permute.xlu1 %344 }
 0x7b7   :  { %v347_v8 = vmul.f32 %v345_v3, %v342_v2 }
 0x7b9   :  { %v349_v10 = vadd.f32 %v348_v6, %v347_v8 }
 0x7bb   :  { %351 = vrot.lane.b32.xlu0 %v349_v10, %s1164_s2 }
 0x82d   :  { %v352_v11 = vpop.permute.xlu0 %351 }
 0x82e   :  { %909 = vst.msk [vmem:[%s1374_s3 + $0x4] sm:$0x3] %vm20_vm0, %v352_v11  ;;  %1012 = vmatmul.mubr.msk.f32.vlgmr.msra.gmra.mrb[2].mxu1 %vm35_vm2, %v352_v11 }
 0x82f   :  { %1090 = vmatpush3.bf16.msra.mxu1 %v1205_v5  ;;  %1033 = vmatprep.mubr.msk.f32.mxu1 %vm1161_vm1, %v1162_v4 }
 0x830   :  { %1091 = vmatprep.subr.bf16.mxu1 %v1160_v0 }
 0x833   :  { %1093 = vmatpush3.bf16.msra.mxu1 %v1214_v7 }
 0x834   :  { %1100 = vmatprep.subr.bf16.mxu1 %v1160_v0 }
 0x901   :  { %v426_v12 = vpop.f32.mrb[2].mxu1 }
 0x902   :  { %v427_v13 = vadd.f32 %v1233_v9, %v426_v12  ;;  %v1013_v14 = vpop.f32.mrb[3].mxu1  ;;  %v922_v12 = vld [vmem:[%s1373_s0 + $0xc] sm:$0x3] }
 0x904   :  { %438 = vrot.lane.b32.xlu1 %v427_v13, %s1163_s24  ;;  %v430_v16 = vadd.f32 %v910_v15, %v427_v13 }
 0x906   :  { %v912_v17 = vmul.f32 -1.442695, %v430_v16 }
 0x908   :  { %1130 = vpow2.f32 %v912_v17 }
 0x912   :  { %v1131_v18 = vpop.eup %1130 }
 0x913   :  { %v434_v19 = vadd.f32 1.0, %v1131_v18 }
 0x915   :  { %1132 = vrcp.f32 %v434_v19 }
 0x91f   :  { %v1133_v20 = vpop.eup %1132 }
 0x920   :  { %v448_v26 = vsub.f32 1.0, %v1133_v20  ;;  %v454_v28 = vmul.f32 %v1133_v20, %v349_v10 }
 0x976   :  { %v439_v21 = vpop.permute.xlu1 %438 }
 0x977   :  { %v441_v22 = vmul.f32 %v1133_v20, %v439_v21 }
 0x979   :  { %443 = vrot.lane.b32.xlu0 %v441_v22, %s1163_s24 }
 0x9eb   :  { %v444_v23 = vpop.permute.xlu0 %443 }
 0x9ec   :  { %v446_v24 = vadd.f32 %v910_v15, %v444_v23 }
 0x9ee   :  { %1134 = vtanh.f32 %v446_v24 }
 0x9f8   :  { %v1135_v25 = vpop.eup %1134 }
 0x9f9   :  { %450 = vrot.lane.b32.xlu1 %v1135_v25, %s1164_s2 }
 0xa6b   :  { %v451_v27 = vpop.permute.xlu1 %450 }
 0xa6c   :  { %v453_v29 = vmul.f32 %v451_v27, %v448_v26 }
 0xa6e   :  { %v455_v30 = vadd.f32 %v454_v28, %v453_v29 }
 0xa70   :  { %457 = vrot.lane.b32.xlu0 %v455_v30, %s1164_s2 }
 0xae2   :  { %v458_v31 = vpop.permute.xlu0 %457 }
 0xae3   :  { %913 = vst.msk [vmem:[%s1374_s3 + $0x6] sm:$0x3] %vm20_vm0, %v458_v31  ;;  %1023 = vmatmul.mubr.msk.f32.vlgmr.msra.gmra.mrb[4].mxu0 %vm35_vm2, %v458_v31 }
 0xae4   :  { %1096 = vmatpush3.bf16.msra.mxu0 %v1205_v5  ;;  %1044 = vmatprep.mubr.msk.f32.mxu0 %vm1161_vm1, %v1162_v4 }
 0xae5   :  { %1097 = vmatprep.subr.bf16.mxu0 %v1160_v0 }
 0xae8   :  { %1099 = vmatpush3.bf16.msra.mxu0 %v1214_v7 }
 0xbb6   :  { %v532_v32 = vpop.f32.mrb[4].mxu0 }
 0xbb7   :  { %v533_v33 = vadd.f32 %v1233_v9, %v532_v32  ;;  %v1024_v34 = vpop.f32.mrb[5].mxu0  ;;  %v926_v32 = vld [vmem:[%s1373_s0 + $0xe] sm:$0x3] }
 0xbb9   :  { %544 = vrot.lane.b32.xlu1 %v533_v33, %s1163_s24  ;;  %v536_v36 = vadd.f32 %v914_v35, %v533_v33 }
 0xbbb   :  { %v916_v37 = vmul.f32 -1.442695, %v536_v36 }
 0xbbd   :  { %1136 = vpow2.f32 %v916_v37 }
 0xbc7   :  { %v1137_v38 = vpop.eup %1136 }
 0xbc8   :  { %v540_v39 = vadd.f32 1.0, %v1137_v38 }
 0xbca   :  { %1138 = vrcp.f32 %v540_v39 }
 0xbd4   :  { %v1139_v40 = vpop.eup %1138 }
 0xbd5   :  { %v554_v46 = vsub.f32 1.0, %v1139_v40  ;;  %v560_v48 = vmul.f32 %v1139_v40, %v455_v30 }
 0xc2b   :  { %v545_v41 = vpop.permute.xlu1 %544 }
 0xc2c   :  { %v547_v42 = vmul.f32 %v1139_v40, %v545_v41 }
 0xc2e   :  { %549 = vrot.lane.b32.xlu0 %v547_v42, %s1163_s24 }
 0xca0   :  { %v550_v43 = vpop.permute.xlu0 %549 }
 0xca1   :  { %v552_v44 = vadd.f32 %v914_v35, %v550_v43 }
 0xca3   :  { %1140 = vtanh.f32 %v552_v44 }
 0xcad   :  { %v1141_v45 = vpop.eup %1140 }
 0xcae   :  { %556 = vrot.lane.b32.xlu1 %v1141_v45, %s1164_s2 }
 0xd20   :  { %v557_v47 = vpop.permute.xlu1 %556 }
 0xd21   :  { %v559_v49 = vmul.f32 %v557_v47, %v554_v46 }
 0xd23   :  { %v561_v50 = vadd.f32 %v560_v48, %v559_v49 }
 0xd25   :  { %563 = vrot.lane.b32.xlu0 %v561_v50, %s1164_s2 }
 0xd97   :  { %v564_v51 = vpop.permute.xlu0 %563 }
 0xd98   :  { %917 = vst.msk [vmem:[%s1374_s3 + $0x8] sm:$0x3] %vm20_vm0, %v564_v51  ;;  %1034 = vmatmul.mubr.msk.f32.vlgmr.msra.gmra.mrb[4].mxu1 %vm35_vm2, %v564_v51 }
 0xd99   :  { %1102 = vmatpush3.bf16.msra.mxu1 %v1205_v5  ;;  %1055 = vmatprep.mubr.msk.f32.mxu1 %vm1161_vm1, %v1162_v4 }
 0xd9a   :  { %1103 = vmatprep.subr.bf16.mxu1 %v1160_v0 }
 0xd9d   :  { %1105 = vmatpush3.bf16.msra.mxu1 %v1214_v7 }
 0xe6b   :  { %v638_v52 = vpop.f32.mrb[4].mxu1 }
 0xe6c   :  { %v639_v53 = vadd.f32 %v1233_v9, %v638_v52  ;;  %v1035_v54 = vpop.f32.mrb[5].mxu1 }
 0xe6e   :  { %650 = vrot.lane.b32.xlu1 %v639_v53, %s1163_s24  ;;  %v642_v56 = vadd.f32 %v918_v55, %v639_v53 }
 0xe70   :  { %v920_v57 = vmul.f32 -1.442695, %v642_v56 }
 0xe72   :  { %1142 = vpow2.f32 %v920_v57 }
 0xe7c   :  { %v1143_v5 = vpop.eup %1142 }
 0xe7d   :  { %v646_v58 = vadd.f32 1.0, %v1143_v5 }
 0xe7f   :  { %1144 = vrcp.f32 %v646_v58 }
 0xe89   :  { %v1145_v4 = vpop.eup %1144 }
 0xe8a   :  { %v660_v62 = vsub.f32 1.0, %v1145_v4  ;;  %v666_v1 = vmul.f32 %v1145_v4, %v561_v50 }
 0xee0   :  { %v651_v0 = vpop.permute.xlu1 %650 }
 0xee1   :  { %v653_v59 = vmul.f32 %v1145_v4, %v651_v0 }
 0xee3   :  { %655 = vrot.lane.b32.xlu0 %v653_v59, %s1163_s24 }
 0xf55   :  { %v656_v7 = vpop.permute.xlu0 %655 }
 0xf56   :  { %v658_v60 = vadd.f32 %v918_v55, %v656_v7 }
 0xf58   :  { %1146 = vtanh.f32 %v658_v60 }
 0xf62   :  { %v1147_v61 = vpop.eup %1146 }
 0xf63   :  { %662 = vrot.lane.b32.xlu1 %v1147_v61, %s1164_s2 }
 0xfd5   :  { %v663_v63 = vpop.permute.xlu1 %662 }
 0xfd6   :  { %v665_v2 = vmul.f32 %v663_v63, %v660_v62 }
 0xfd8   :  { %v667_v3 = vadd.f32 %v666_v1, %v665_v2 }
 0xfda   :  { %669 = vrot.lane.b32.xlu0 %v667_v3, %s1164_s2 }
0x104c   :  { %v670_v6 = vpop.permute.xlu0 %669 }
0x104d   :  { %921 = vst.msk [vmem:[%s1374_s3 + $0xa] sm:$0x3] %vm20_vm0, %v670_v6  ;;  %1045 = vmatmul.mubr.msk.f32.vlgmr.msra.gmra.mrb[6].mxu0 %vm35_vm2, %v670_v6 }
0x1120   :  { %v744_v8 = vpop.f32.mrb[6].mxu0 }
0x1121   :  { %v745_v10 = vadd.f32 %v1233_v9, %v744_v8  ;;  %v1046_v11 = vpop.f32.mrb[7].mxu0 }
0x1123   :  { %756 = vrot.lane.b32.xlu1 %v745_v10, %s1163_s24  ;;  %v748_v13 = vadd.f32 %v922_v12, %v745_v10 }
0x1125   :  { %v924_v14 = vmul.f32 -1.442695, %v748_v13 }
0x1127   :  { %1148 = vpow2.f32 %v924_v14 }
0x1131   :  { %v1149_v15 = vpop.eup %1148 }
0x1132   :  { %v752_v16 = vadd.f32 1.0, %v1149_v15 }
0x1134   :  { %1150 = vrcp.f32 %v752_v16 }
0x113e   :  { %v1151_v17 = vpop.eup %1150 }
0x113f   :  { %v766_v23 = vsub.f32 1.0, %v1151_v17  ;;  %v772_v25 = vmul.f32 %v1151_v17, %v667_v3 }
0x1195   :  { %v757_v18 = vpop.permute.xlu1 %756 }
0x1196   :  { %v759_v19 = vmul.f32 %v1151_v17, %v757_v18 }
0x1198   :  { %761 = vrot.lane.b32.xlu0 %v759_v19, %s1163_s24 }
0x120a   :  { %v762_v20 = vpop.permute.xlu0 %761 }
0x120b   :  { %v764_v21 = vadd.f32 %v922_v12, %v762_v20 }
0x120d   :  { %1152 = vtanh.f32 %v764_v21 }
0x1217   :  { %v1153_v22 = vpop.eup %1152 }
0x1218   :  { %768 = vrot.lane.b32.xlu1 %v1153_v22, %s1164_s2 }
0x128a   :  { %v769_v24 = vpop.permute.xlu1 %768 }
0x128b   :  { %v771_v26 = vmul.f32 %v769_v24, %v766_v23 }
0x128d   :  { %v773_v27 = vadd.f32 %v772_v25, %v771_v26 }
0x128f   :  { %775 = vrot.lane.b32.xlu0 %v773_v27, %s1164_s2 }
0x1301   :  { %v776_v28 = vpop.permute.xlu0 %775 }
0x1302   :  { %925 = vst.msk [vmem:[%s1374_s3 + $0xc] sm:$0x3] %vm20_vm0, %v776_v28  ;;  %1056 = vmatmul.mubr.msk.f32.vlgmr.msra.gmra.mrb[6].mxu1 %vm35_vm2, %v776_v28 }
0x13d5   :  { %v850_v29 = vpop.f32.mrb[6].mxu1 }
0x13d6   :  { %v851_v30 = vadd.f32 %v1233_v9, %v850_v29  ;;  %v1057_v31 = vpop.f32.mrb[7].mxu1 }
0x13d8   :  { %862 = vrot.lane.b32.xlu1 %v851_v30, %s1163_s24  ;;  %v854_v33 = vadd.f32 %v926_v32, %v851_v30 }
0x13da   :  { %v928_v34 = vmul.f32 -1.442695, %v854_v33 }
0x13dc   :  { %1154 = vpow2.f32 %v928_v34 }
0x13e6   :  { %v1155_v35 = vpop.eup %1154 }
0x13e7   :  { %v858_v36 = vadd.f32 1.0, %v1155_v35 }
0x13e9   :  { %1156 = vrcp.f32 %v858_v36 }
0x13f3   :  { %v1157_v37 = vpop.eup %1156 }
0x13f4   :  { %v872_v42 = vsub.f32 1.0, %v1157_v37  ;;  %v878_v44 = vmul.f32 %v1157_v37, %v773_v27 }
0x144a   :  { %v863_v38 = vpop.permute.xlu1 %862 }
0x144b   :  { %v865_v39 = vmul.f32 %v1157_v37, %v863_v38 }
0x144d   :  { %867 = vrot.lane.b32.xlu0 %v865_v39, %s1163_s24 }
0x14bf   :  { %v868_v40 = vpop.permute.xlu0 %867 }
0x14c0   :  { %v870_v9 = vadd.f32 %v926_v32, %v868_v40 }
0x14c2   :  { %1158 = vtanh.f32 %v870_v9 }
0x14cc   :  { %v1159_v41 = vpop.eup %1158 }
0x14cd   :  { %874 = vrot.lane.b32.xlu1 %v1159_v41, %s1164_s2 }
0x153f   :  { %v875_v43 = vpop.permute.xlu1 %874 }
0x1540   :  { %v877_v45 = vmul.f32 %v875_v43, %v872_v42 }
0x1542   :  { %v879_v46 = vadd.f32 %v878_v44, %v877_v45 }
0x1544   :  { %881 = vrot.lane.b32.xlu0 %v879_v46, %s1164_s2 }
0x15b6   :  { %v882_v47 = vpop.permute.xlu0 %881 }
0x15b7   :  { %929 = vst.msk [vmem:[%s1374_s3 + $0xe] sm:$0x3] %vm20_vm0, %v882_v47  ;;  %886 = vst.msk [vmem:[#allocation2] sm:$0x3] %vm20_vm0, %v882_v47 }
0x15b8   :  { %890 = vst.msk [vmem:[%s1375_s4] sm:$0x3] %vm20_vm0, %v882_v47 }

// kernel: gru_plain_forward.9
= control target key start
LH: loop header
LB: loop body
LE: loop exit
PB: predicated region body
PF: predicated region fallthrough
CT: control target
= control target key end

     0   :  { %vm33_vm0 = vcmask 261120   ;;  %vm209_vm1 = vcmask 130048   ;;  %s348_s1 = inlined_call_operand.vmem [shape: f32[32,32], index: 1, kind: input, shape index: {}]   ;;  %s349_s0 = inlined_call_operand.vmem [shape: f32[16,32], index: 0, kind: input, shape index: {}]   ;;  %s350_s3 = inlined_call_operand.vmem [shape: f32[32,16], index: 3, kind: input, shape index: {}]   ;;  %s351_s2 = inlined_call_operand.vmem [shape: f32[1,32], index: 2, kind: input, shape index: {}]   ;;  %s352_s4 = inlined_call_operand.vmem [shape: f32[1,16], index: 4, kind: input, shape index: {}]   ;;  %s353_s5 = inlined_call_operand.vmem [shape: f32[16,16], index: 5, kind: output, shape index: {}]  }
   0x1   :  { %v22_v0 = vld [vmem:[%s348_s1] sm:$0xff]  ;;  %v23_v1 = vld [vmem:[%s348_s1 + $0x8] sm:$0xff]  ;;  %v24_v2 = vld [vmem:[%s348_s1 + $0x10] sm:$0xff] }
   0x2   :  { %v256_v3 = vpack.c.bf16 %v23_v1, %v22_v0  ;;  %v25_v4 = vld [vmem:[%s348_s1 + $0x18] sm:$0xff]  ;;  %v20_v5 = vld [vmem:[%s349_s0] sm:$0xff]  ;;  %v118_v8 = vld [vmem:[%s350_s3 + $0x8] sm:$0xff] }
   0x3   :  { %v260_v6 = vpack.c.bf16 %v25_v4, %v24_v2  ;;  %242 = vmatprep.mubr.msk.f32.mxu0 %vm33_vm0, %v20_v5  ;;  %v117_v7 = vld [vmem:[%s350_s3] sm:$0xff]  ;;  %v21_v10 = vld [vmem:[%s349_s0 + $0x8] sm:$0xff]  ;;  %v119_v11 = vld [vmem:[%s350_s3 + $0x10] sm:$0xff] }
   0x4   :  { %257 = vmatprep.subr.bf16.mxu0 %v256_v3  ;;  %v264_v9 = vpack.c.bf16 %v118_v8, %v117_v7  ;;  %v120_v12 = vld [vmem:[%s350_s3 + $0x18] sm:$0xff]  ;;  %v216_v14 = vld [vmem:[%s351_s2] ss:$0 sm:$0xff] }
   0x5   :  { %259 = vmatpush3.bf16.msra.mxu0 %v256_v3  ;;  %v268_v13 = vpack.c.bf16 %v120_v12, %v119_v11  ;;  %v219_v21 = vld [vmem:[%s352_s4] ss:$0 sm:$0xff] }
   0x6   :  { %261 = vmatprep.subr.bf16.mxu0 %v260_v6  ;;  %265 = vmatprep.subr.bf16.mxu1 %v264_v9 }
   0x7   :  { %267 = vmatpush3.bf16.msra.mxu1 %v264_v9 }
   0x8   :  { %269 = vmatprep.subr.bf16.mxu1 %v268_v13 }
   0x9   :  { %263 = vmatpush3.bf16.msra.mxu0 %v260_v6 }
   0xb   :  { %271 = vmatpush3.bf16.msra.mxu1 %v268_v13 }
   0xc   :  { %243 = vmatmul.mubr.msk.f32.vlgmr.msra.gmra.mrb[0].mxu0 %vm33_vm0, %v21_v10 }
  0xdf   :  { %v244_v15 = vpop.f32.mrb[0].mxu0 }
  0xe0   :  { %v112_v16 = vadd.f32 %v244_v15, %v216_v14  ;;  %v106_v17 = vpop.f32.mrb[1].mxu0 }
  0xe1   :  { %v107_v18 = vadd.f32 %v216_v14, %v106_v17 }
  0xe2   :  { %v116_v20 = vmax.f32 %v112_v16, 0.0 }
  0xe3   :  { %v115_v19 = vmax.f32 %v107_v18, 0.0 }
  0xe5   :  { %253 = vmatprep.mubr.msk.f32.mxu1 %vm33_vm0, %v115_v19 }
  0xe6   :  { %254 = vmatmul.mubr.msk.f32.vlgmr.msra.gmra.mrb[0].mxu1 %vm33_vm0, %v116_v20 }
 0x1b9   :  { %v255_v22 = vpop.f32.mrb[0].mxu1 }
 0x1ba   :  { %v206_v23 = vadd.f32 %v255_v22, %v219_v21  ;;  %v200_v24 = vpop.f32.mrb[1].mxu1 }
 0x1bb   :  { %v201_v25 = vadd.f32 %v219_v21, %v200_v24 }
 0x1bc   :  { %211 = vst.msk [vmem:[%s353_s5 + $0x8] sm:$0xff] %vm209_vm1, %v206_v23 }
 0x1bd   :  { %210 = vst.msk [vmem:[%s353_s5] sm:$0xff] %vm209_vm1, %v201_v25 }

</bundles_post_ra>
